<compile_context>
chip_gen: v5e
topology: v5e:2x2
jax: 0.10.0
libtpu: 0.0.40
codegen_flags: <defaults>
</compile_context>

<pallas_src>
import numpy as np
import jax
import jax.numpy as jnp
from jax import lax
from jax.experimental import pallas as pl
from jax.experimental.pallas import tpu as pltpu


# -----------------------------------------------------------------------------
# Pallas kernels
# -----------------------------------------------------------------------------
def make_bilstm_kernel(num_layers, T, B2, H):
    """Fused multi-layer LSTM over one direction (selected by the grid axis).

    Kernel refs (in order):
      lens_ref : [B2, 1] int32   per-row valid length (T_p for premise rows,
                                  T_h for hypothesis rows)
      x_ref    : [T, B2, E]      time-major embeddings for this direction
      per layer l:  wih [in_l, 4H], whh [H, 4H], b [1, 4H]   (PyTorch i,f,g,o order)
      cfin_ref : [B2, H]         final cell state of the last layer
      hseq_scr : [T, B2, H]      VMEM scratch for the inter-layer hidden sequence
    """

    def kernel(*refs):
        lens_ref = refs[0]
        x_ref = refs[1]
        w_refs = refs[2:2 + 3 * num_layers]
        cfin_ref = refs[2 + 3 * num_layers]
        hseq_scr = refs[3 + 3 * num_layers]

        lens = lens_ref[...]                                # [B2, 1] int32
        cur2d = x_ref[...].reshape(T * B2, -1)              # [T*B2, E], t-major blocks

        c = jnp.zeros((B2, H), jnp.float32)
        for l in range(num_layers):
            wih = w_refs[3 * l][...]                        # [in_l, 4H]
            whh = w_refs[3 * l + 1][...]                    # [H, 4H]
            b = w_refs[3 * l + 2][...]                      # [1, 4H]

            # Hoisted input->gates matmul: one MXU call for the whole sequence.
            gx = jnp.dot(cur2d, wih,
                         preferred_element_type=jnp.float32) + b   # [T*B2, 4H]

            h = jnp.zeros((B2, H), jnp.float32)
            c = jnp.zeros((B2, H), jnp.float32)
            last = (l == num_layers - 1)

            # Full unroll: T is static and small; only h @ Whh stays on the
            # serial critical path.
            for t in range(T):
                gates = gx[t * B2:(t + 1) * B2, :] + jnp.dot(
                    h, whh, preferred_element_type=jnp.float32)    # [B2, 4H]
                sg = jax.nn.sigmoid(gates)      # one EUP pass over the full tile
                th = jnp.tanh(gates)            # one EUP pass over the full tile
                i = sg[:, 0 * H:1 * H]
                f = sg[:, 1 * H:2 * H]
                g = th[:, 2 * H:3 * H]
                o = sg[:, 3 * H:4 * H]
                c_new = f * c + i * g
                h_new = o * jnp.tanh(c_new)
                # Freeze rows whose sequence type is shorter than the common T
                # (matches PyTorch: each LSTM runs exactly T_p / T_h steps).
                valid = t < lens                # [B2, 1] bool
                h = jnp.where(valid, h_new, h)
                c = jnp.where(valid, c_new, c)
                if not last:
                    hseq_scr[t] = h             # inter-layer h stays in VMEM
            if not last:
                cur2d = hseq_scr[...].reshape(T * B2, H)

        cfin_ref[...] = c                       # only output: final cell state

    return kernel


def make_head_kernel(B):
    """concat(p_fwd, p_bwd, h_fwd, h_bwd) -> Linear(4H,H) -> ReLU -> Linear(H,C)."""

    def kernel(cfin_ref, w1_ref, b1_ref, w2_ref, b2_ref, out_ref):
        cf = cfin_ref[...]                      # [2, 2B, H]: dir x (premise | hypothesis)
        fwd, bwd = cf[0], cf[1]
        concat = jnp.concatenate(
            [fwd[0:B], bwd[0:B], fwd[B:2 * B], bwd[B:2 * B]], axis=1)   # [B, 4H] lane-dense
        x = jnp.dot(concat, w1_ref[...],
                    preferred_element_type=jnp.float32) + b1_ref[...]
        x = jnp.maximum(x, 0.0)
        out_ref[...] = jnp.dot(x, w2_ref[...],
                               preferred_element_type=jnp.float32) + b2_ref[...]

    return kernel


# -----------------------------------------------------------------------------
# Wrappers
# -----------------------------------------------------------------------------
def run_bilstm(x, lens, layer_params):
    """x: [2, T, B2, E] (dir 0 = forward LSTM input, dir 1 = backward LSTM input).

    Returns final cell states [2, B2, H] of the last layer, per direction.
    """
    ndir, T, B2, E = x.shape
    H = layer_params[0][1].shape[1]             # whh stacked: [2, H, 4H]
    num_layers = len(layer_params)

    in_specs = [
        pl.BlockSpec((B2, 1), lambda d: (0, 0)),                    # lens (shared)
        pl.BlockSpec((None, T, B2, E), lambda d: (d, 0, 0, 0)),     # per-direction x
    ]
    weight_args = []
    for (wih, whh, b) in layer_params:
        in_dim = wih.shape[1]
        weight_args += [wih, whh, b]
        in_specs += [
            pl.BlockSpec((None, in_dim, 4 * H), lambda d: (d, 0, 0)),
            pl.BlockSpec((None, H, 4 * H), lambda d: (d, 0, 0)),
            pl.BlockSpec((None, 1, 4 * H), lambda d: (d, 0, 0)),
        ]

    return pl.pallas_call(
        make_bilstm_kernel(num_layers, T, B2, H),
        out_shape=jax.ShapeDtypeStruct((ndir, B2, H), jnp.float32),
        grid_spec=pltpu.PrefetchScalarGridSpec(
            num_scalar_prefetch=0,
            grid=(ndir,),
            in_specs=in_specs,
            out_specs=pl.BlockSpec((None, B2, H), lambda d: (d, 0, 0)),
            scratch_shapes=[pltpu.VMEM((T, B2, H), jnp.float32)],
        ),
        compiler_params=pltpu.CompilerParams(
            dimension_semantics=("parallel",)),   # fwd/bwd shard across TCs on v7x
    )(lens, x, *weight_args)


def run_head(cfin, w1, b1, w2, b2):
    ndir, B2, H = cfin.shape
    B = B2 // 2
    C = w2.shape[1]
    vmem = lambda: pl.BlockSpec(memory_space=pltpu.MemorySpace.VMEM)
    return pl.pallas_call(
        make_head_kernel(B),
        out_shape=jax.ShapeDtypeStruct((B, C), jnp.float32),
        in_specs=[vmem() for _ in range(5)],
        out_specs=vmem(),
    )(cfin, w1, b1, w2, b2)


def fix_padding(batch_premises, batch_hypotheses):
    """Same semantics as the PyTorch fix_padding (flip before padding, pad with 0)."""
    def pad(seqs):
        L = max(len(s) for s in seqs)
        return np.array([list(s) + [0] * (L - len(s)) for s in seqs], dtype=np.int32)
    premises = pad(batch_premises)
    hypotheses = pad(batch_hypotheses)
    reverse_premises = pad([list(reversed(s)) for s in batch_premises])
    reverse_hypotheses = pad([list(reversed(s)) for s in batch_hypotheses])
    return premises, hypotheses, reverse_premises, reverse_hypotheses


def init_params(key, vocab_size, embed_dim, hidden_dim, num_layers, num_classes):
    keys = iter(jax.random.split(key, 16 * num_layers + 8))
    k = 1.0 / np.sqrt(hidden_dim)

    def unif(shape):
        return jax.random.uniform(next(keys), shape, jnp.float32, -k, k)

    # Embedding (padding_idx=0 -> row 0 is zeros).
    emb = jax.random.normal(next(keys), (vocab_size, embed_dim), jnp.float32)
    emb = emb.at[0].set(0.0)

    # Per layer, stack the two directions (0: lstm_forward, 1: lstm_backward).
    layers = []
    for l in range(num_layers):
        in_dim = embed_dim if l == 0 else hidden_dim
        wih_d, whh_d, b_d = [], [], []
        for _ in range(2):
            w_ih = unif((4 * hidden_dim, in_dim))       # PyTorch layout [4H, in]
            w_hh = unif((4 * hidden_dim, hidden_dim))   # PyTorch layout [4H, H]
            b_ih = unif((4 * hidden_dim,))
            b_hh = unif((4 * hidden_dim,))
            wih_d.append(w_ih.T)                        # pre-transposed [in, 4H]
            whh_d.append(w_hh.T)                        # pre-transposed [H, 4H]
            b_d.append((b_ih + b_hh)[None, :])          # combined bias [1, 4H]
        layers.append((jnp.stack(wih_d), jnp.stack(whh_d), jnp.stack(b_d)))

    params = {
        "embedding": emb,
        "lstm_layers": layers,                           # stacked over 2 directions
        "int_w": unif((hidden_dim, 4 * hidden_dim)).T,   # pre-transposed [4H, H]
        "int_b": unif((hidden_dim,))[None, :],
        "out_w": unif((num_classes, hidden_dim)).T,      # pre-transposed [H, C]
        "out_b": unif((num_classes,))[None, :],
    }
    return params


def shallow_bilstm_forward(params, batch_premises, batch_hypotheses):
    premises, hypotheses, p_back, h_back = fix_padding(batch_premises, batch_hypotheses)
    B = premises.shape[0]
    T_p, T_h = premises.shape[1], hypotheses.shape[1]
    Tc = max(T_p, T_h)

    def pad_to(a):
        return np.pad(a, ((0, 0), (0, Tc - a.shape[1])))

    # Rows 0..B-1 = premises, rows B..2B-1 = hypotheses (pad id 0 -> zero embedding).
    tok_fwd = np.concatenate([pad_to(premises), pad_to(hypotheses)], axis=0)    # [2B, Tc]
    tok_bwd = np.concatenate([pad_to(p_back), pad_to(h_back)], axis=0)          # [2B, Tc]

    emb = params["embedding"]

    def embed_time_major(tok):
        e = jnp.take(emb, jnp.asarray(tok, jnp.int32), axis=0)   # [2B, Tc, E]
        return jnp.transpose(e, (1, 0, 2))                       # [Tc, 2B, E]

    # TODO(synk): embedding gather stays in plain JAX (jnp.take); no clean tiny-scale
    # Pallas gather equivalent is warranted for this path.
    x = jnp.stack([embed_time_major(tok_fwd), embed_time_major(tok_bwd)], axis=0)  # [2, Tc, 2B, E]

    # Per-row valid lengths: reference LSTMs run exactly T_p / T_h steps.
    lens = jnp.asarray([T_p] * B + [T_h] * B, jnp.int32)[:, None]                  # [2B, 1]

    cfin = run_bilstm(x, lens, params["lstm_layers"])                              # [2, 2B, H]
    return run_head(cfin, params["int_w"], params["int_b"],
                    params["out_w"], params["out_b"])


# -----------------------------------------------------------------------------
# Main
# -----------------------------------------------------------------------------
if __name__ == "__main__":
    VOCAB, EMBED, HIDDEN, LAYERS, CLASSES = 50, 32, 32, 2, 3

    key = jax.random.PRNGKey(0)
    key, pkey, tkey = jax.random.split(key, 3)
    params = init_params(pkey, VOCAB, EMBED, HIDDEN, LAYERS, CLASSES)

    # Deterministic variable-length token sequences (batch of 2), pad id is 0.
    toks = np.asarray(jax.random.randint(tkey, (4, 8), 1, VOCAB), dtype=np.int32)
    batch_premises = [list(toks[0, :7]), list(toks[1, :5])]
    batch_hypotheses = [list(toks[2, :6]), list(toks[3, :8])]

    y = shallow_bilstm_forward(params, batch_premises, batch_hypotheses)
    y = jax.block_until_ready(y)
    assert y.shape == (2, CLASSES) and y.dtype == jnp.float32
    print("KERNEL_OK")
</pallas_src>

<mosaic_0001>
module attributes {stable_mosaic.version = 11 : i64} {
  func.func @kernel(%arg0: i32, %arg1: memref<4x1xi32, #tpu.memory_space<vmem>>, %arg2: memref<1x8x4x32xf32, #tpu.memory_space<vmem>>, %arg3: memref<1x32x128xf32, #tpu.memory_space<vmem>>, %arg4: memref<1x32x128xf32, #tpu.memory_space<vmem>>, %arg5: memref<1x1x128xf32, #tpu.memory_space<vmem>>, %arg6: memref<1x32x128xf32, #tpu.memory_space<vmem>>, %arg7: memref<1x32x128xf32, #tpu.memory_space<vmem>>, %arg8: memref<1x1x128xf32, #tpu.memory_space<vmem>>, %arg9: memref<1x4x32xf32, #tpu.memory_space<vmem>>, %arg10: memref<8x4x32xf32, #tpu.memory_space<vmem>>) attributes {dimension_semantics = [#tpu.dimension_semantics<parallel>], iteration_bounds = array<i64: 2>, scalar_prefetch = 0 : i64, scratch_operands = 1 : i64, tpu.core_type = #tpu.core_type<tc>, window_params = [{pipeline_mode = #tpu.pipeline_mode<synchronous>, transform_indices = @transform_0, window_bounds = array<i64: 4, 1>}, {transform_indices = @transform_1, window_bounds = array<i64: 1, 8, 4, 32>}, {transform_indices = @transform_2, window_bounds = array<i64: 1, 32, 128>}, {transform_indices = @transform_3, window_bounds = array<i64: 1, 32, 128>}, {transform_indices = @transform_4, window_bounds = array<i64: 1, 1, 128>}, {transform_indices = @transform_5, window_bounds = array<i64: 1, 32, 128>}, {transform_indices = @transform_6, window_bounds = array<i64: 1, 32, 128>}, {transform_indices = @transform_7, window_bounds = array<i64: 1, 1, 128>}, {transform_indices = @transform_8, window_bounds = array<i64: 1, 4, 32>}]} {
    %c0 = arith.constant 0 : index
    %c0_0 = arith.constant 0 : index
    %0 = vector.load %arg1[%c0, %c0_0] : memref<4x1xi32, #tpu.memory_space<vmem>>, vector<4x1xi32>
    %c0_1 = arith.constant 0 : index
    %c0_2 = arith.constant 0 : index
    %c0_3 = arith.constant 0 : index
    %c0_4 = arith.constant 0 : index
    %1 = vector.load %arg2[%c0_1, %c0_2, %c0_3, %c0_4] : memref<1x8x4x32xf32, #tpu.memory_space<vmem>>, vector<1x8x4x32xf32>
    %2 = vector.shape_cast %1 : vector<1x8x4x32xf32> to vector<8x4x32xf32>
    %3 = vector.shape_cast %2 : vector<8x4x32xf32> to vector<32x32xf32>
    %c0_5 = arith.constant 0 : index
    %c0_6 = arith.constant 0 : index
    %c0_7 = arith.constant 0 : index
    %4 = vector.load %arg3[%c0_5, %c0_6, %c0_7] : memref<1x32x128xf32, #tpu.memory_space<vmem>>, vector<1x32x128xf32>
    %5 = vector.shape_cast %4 : vector<1x32x128xf32> to vector<32x128xf32>
    %c0_8 = arith.constant 0 : index
    %c0_9 = arith.constant 0 : index
    %c0_10 = arith.constant 0 : index
    %6 = vector.load %arg4[%c0_8, %c0_9, %c0_10] : memref<1x32x128xf32, #tpu.memory_space<vmem>>, vector<1x32x128xf32>
    %7 = vector.shape_cast %6 : vector<1x32x128xf32> to vector<32x128xf32>
    %c0_11 = arith.constant 0 : index
    %c0_12 = arith.constant 0 : index
    %c0_13 = arith.constant 0 : index
    %8 = vector.load %arg5[%c0_11, %c0_12, %c0_13] : memref<1x1x128xf32, #tpu.memory_space<vmem>>, vector<1x1x128xf32>
    %9 = vector.shape_cast %8 : vector<1x1x128xf32> to vector<1x128xf32>
    %cst = arith.constant dense<0.000000e+00> : vector<32x128xf32>
    %10 = tpu.matmul %3, %5, %cst {dimension_numbers = #tpu.dot_dimension_numbers<[1], [0], [0], [1], [0, 0, 1, 1], [], []>} : vector<32x32xf32>, vector<32x128xf32>, vector<32x128xf32> -> vector<32x128xf32>
    %11 = vector.broadcast %9 : vector<1x128xf32> to vector<32x128xf32>
    %12 = arith.addf %10, %11 : vector<32x128xf32>
    %cst_14 = arith.constant 0.000000e+00 : f32
    %13 = vector.broadcast %cst_14 : f32 to vector<4x32xf32>
    %cst_15 = arith.constant 0.000000e+00 : f32
    %14 = vector.broadcast %cst_15 : f32 to vector<4x32xf32>
    %15 = vector.extract_strided_slice %12 {offsets = [0, 0], sizes = [4, 128], strides = [1, 1]} : vector<32x128xf32> to vector<4x128xf32>
    %cst_16 = arith.constant dense<0.000000e+00> : vector<4x128xf32>
    %16 = tpu.matmul %13, %7, %cst_16 {dimension_numbers = #tpu.dot_dimension_numbers<[1], [0], [0], [1], [0, 0, 1, 1], [], []>} : vector<4x32xf32>, vector<32x128xf32>, vector<4x128xf32> -> vector<4x128xf32>
    %17 = arith.addf %15, %16 : vector<4x128xf32>
    %18 = arith.negf %17 : vector<4x128xf32>
    %19 = math.exp %18 : vector<4x128xf32>
    %cst_17 = arith.constant 1.000000e+00 : f32
    %20 = vector.broadcast %cst_17 : f32 to vector<4x128xf32>
    %21 = arith.addf %20, %19 : vector<4x128xf32>
    %22 = arith.divf %20, %21 : vector<4x128xf32>
    %23 = math.tanh %17 : vector<4x128xf32>
    %24 = vector.extract_strided_slice %22 {offsets = [0, 0], sizes = [4, 32], strides = [1, 1]} : vector<4x128xf32> to vector<4x32xf32>
    %25 = vector.extract_strided_slice %22 {offsets = [0, 32], sizes = [4, 32], strides = [1, 1]} : vector<4x128xf32> to vector<4x32xf32>
    %26 = vector.extract_strided_slice %23 {offsets = [0, 64], sizes = [4, 32], strides = [1, 1]} : vector<4x128xf32> to vector<4x32xf32>
    %27 = vector.extract_strided_slice %22 {offsets = [0, 96], sizes = [4, 32], strides = [1, 1]} : vector<4x128xf32> to vector<4x32xf32>
    %28 = arith.mulf %25, %14 : vector<4x32xf32>
    %29 = arith.mulf %24, %26 : vector<4x32xf32>
    %30 = arith.addf %28, %29 : vector<4x32xf32>
    %31 = math.tanh %30 : vector<4x32xf32>
    %32 = arith.mulf %27, %31 : vector<4x32xf32>
    %c0_i32 = arith.constant 0 : i32
    %33 = vector.broadcast %c0_i32 : i32 to vector<4x1xi32>
    %34 = arith.cmpi sgt, %0, %33 : vector<4x1xi32>
    %35 = vector.shape_cast %34 : vector<4x1xi1> to vector<4x1xi1>
    %36 = vector.broadcast %35 : vector<4x1xi1> to vector<4x32xi1>
    %37 = arith.select %36, %32, %13 : vector<4x32xi1>, vector<4x32xf32>
    %38 = vector.shape_cast %34 : vector<4x1xi1> to vector<4x1xi1>
    %39 = vector.broadcast %38 : vector<4x1xi1> to vector<4x32xi1>
    %40 = arith.select %39, %30, %14 : vector<4x32xi1>, vector<4x32xf32>
    %c0_18 = arith.constant 0 : index
    %c0_19 = arith.constant 0 : index
    %c0_20 = arith.constant 0 : index
    %41 = vector.load %arg10[%c0_18, %c0_19, %c0_20] : memref<8x4x32xf32, #tpu.memory_space<vmem>>, vector<1x4x32xf32>
    %42 = vector.shape_cast %41 : vector<1x4x32xf32> to vector<4x32xf32>
    %43 = vector.shape_cast %37 : vector<4x32xf32> to vector<1x4x32xf32>
    tpu.vector_store %arg10[%c0_18, %c0_19, %c0_20], %43 {strides = array<i32>} : memref<8x4x32xf32, #tpu.memory_space<vmem>>, vector<1x4x32xf32>,
    %44 = vector.extract_strided_slice %12 {offsets = [4, 0], sizes = [4, 128], strides = [1, 1]} : vector<32x128xf32> to vector<4x128xf32>
    %cst_21 = arith.constant dense<0.000000e+00> : vector<4x128xf32>
    %45 = tpu.matmul %37, %7, %cst_21 {dimension_numbers = #tpu.dot_dimension_numbers<[1], [0], [0], [1], [0, 0, 1, 1], [], []>} : vector<4x32xf32>, vector<32x128xf32>, vector<4x128xf32> -> vector<4x128xf32>
    %46 = arith.addf %44, %45 : vector<4x128xf32>
    %47 = arith.negf %46 : vector<4x128xf32>
    %48 = math.exp %47 : vector<4x128xf32>
    %cst_22 = arith.constant 1.000000e+00 : f32
    %49 = vector.broadcast %cst_22 : f32 to vector<4x128xf32>
    %50 = arith.addf %49, %48 : vector<4x128xf32>
    %51 = arith.divf %49, %50 : vector<4x128xf32>
    %52 = math.tanh %46 : vector<4x128xf32>
    %53 = vector.extract_strided_slice %51 {offsets = [0, 0], sizes = [4, 32], strides = [1, 1]} : vector<4x128xf32> to vector<4x32xf32>
    %54 = vector.extract_strided_slice %51 {offsets = [0, 32], sizes = [4, 32], strides = [1, 1]} : vector<4x128xf32> to vector<4x32xf32>
    %55 = vector.extract_strided_slice %52 {offsets = [0, 64], sizes = [4, 32], strides = [1, 1]} : vector<4x128xf32> to vector<4x32xf32>
    %56 = vector.extract_strided_slice %51 {offsets = [0, 96], sizes = [4, 32], strides = [1, 1]} : vector<4x128xf32> to vector<4x32xf32>
    %57 = arith.mulf %54, %40 : vector<4x32xf32>
    %58 = arith.mulf %53, %55 : vector<4x32xf32>
    %59 = arith.addf %57, %58 : vector<4x32xf32>
    %60 = math.tanh %59 : vector<4x32xf32>
    %61 = arith.mulf %56, %60 : vector<4x32xf32>
    %c1_i32 = arith.constant 1 : i32
    %62 = vector.broadcast %c1_i32 : i32 to vector<4x1xi32>
    %63 = arith.cmpi sgt, %0, %62 : vector<4x1xi32>
    %64 = vector.shape_cast %63 : vector<4x1xi1> to vector<4x1xi1>
    %65 = vector.broadcast %64 : vector<4x1xi1> to vector<4x32xi1>
    %66 = arith.select %65, %61, %37 : vector<4x32xi1>, vector<4x32xf32>
    %67 = vector.shape_cast %63 : vector<4x1xi1> to vector<4x1xi1>
    %68 = vector.broadcast %67 : vector<4x1xi1> to vector<4x32xi1>
    %69 = arith.select %68, %59, %40 : vector<4x32xi1>, vector<4x32xf32>
    %c1 = arith.constant 1 : index
    %c0_23 = arith.constant 0 : index
    %c0_24 = arith.constant 0 : index
    %70 = vector.load %arg10[%c1, %c0_23, %c0_24] : memref<8x4x32xf32, #tpu.memory_space<vmem>>, vector<1x4x32xf32>
    %71 = vector.shape_cast %70 : vector<1x4x32xf32> to vector<4x32xf32>
    %72 = vector.shape_cast %66 : vector<4x32xf32> to vector<1x4x32xf32>
    tpu.vector_store %arg10[%c1, %c0_23, %c0_24], %72 {strides = array<i32>} : memref<8x4x32xf32, #tpu.memory_space<vmem>>, vector<1x4x32xf32>,
    %73 = vector.extract_strided_slice %12 {offsets = [8, 0], sizes = [4, 128], strides = [1, 1]} : vector<32x128xf32> to vector<4x128xf32>
    %cst_25 = arith.constant dense<0.000000e+00> : vector<4x128xf32>
    %74 = tpu.matmul %66, %7, %cst_25 {dimension_numbers = #tpu.dot_dimension_numbers<[1], [0], [0], [1], [0, 0, 1, 1], [], []>} : vector<4x32xf32>, vector<32x128xf32>, vector<4x128xf32> -> vector<4x128xf32>
    %75 = arith.addf %73, %74 : vector<4x128xf32>
    %76 = arith.negf %75 : vector<4x128xf32>
    %77 = math.exp %76 : vector<4x128xf32>
    %cst_26 = arith.constant 1.000000e+00 : f32
    %78 = vector.broadcast %cst_26 : f32 to vector<4x128xf32>
    %79 = arith.addf %78, %77 : vector<4x128xf32>
    %80 = arith.divf %78, %79 : vector<4x128xf32>
    %81 = math.tanh %75 : vector<4x128xf32>
    %82 = vector.extract_strided_slice %80 {offsets = [0, 0], sizes = [4, 32], strides = [1, 1]} : vector<4x128xf32> to vector<4x32xf32>
    %83 = vector.extract_strided_slice %80 {offsets = [0, 32], sizes = [4, 32], strides = [1, 1]} : vector<4x128xf32> to vector<4x32xf32>
    %84 = vector.extract_strided_slice %81 {offsets = [0, 64], sizes = [4, 32], strides = [1, 1]} : vector<4x128xf32> to vector<4x32xf32>
    %85 = vector.extract_strided_slice %80 {offsets = [0, 96], sizes = [4, 32], strides = [1, 1]} : vector<4x128xf32> to vector<4x32xf32>
    %86 = arith.mulf %83, %69 : vector<4x32xf32>
    %87 = arith.mulf %82, %84 : vector<4x32xf32>
    %88 = arith.addf %86, %87 : vector<4x32xf32>
    %89 = math.tanh %88 : vector<4x32xf32>
    %90 = arith.mulf %85, %89 : vector<4x32xf32>
    %c2_i32 = arith.constant 2 : i32
    %91 = vector.broadcast %c2_i32 : i32 to vector<4x1xi32>
    %92 = arith.cmpi sgt, %0, %91 : vector<4x1xi32>
    %93 = vector.shape_cast %92 : vector<4x1xi1> to vector<4x1xi1>
    %94 = vector.broadcast %93 : vector<4x1xi1> to vector<4x32xi1>
    %95 = arith.select %94, %90, %66 : vector<4x32xi1>, vector<4x32xf32>
    %96 = vector.shape_cast %92 : vector<4x1xi1> to vector<4x1xi1>
    %97 = vector.broadcast %96 : vector<4x1xi1> to vector<4x32xi1>
    %98 = arith.select %97, %88, %69 : vector<4x32xi1>, vector<4x32xf32>
    %c2 = arith.constant 2 : index
    %c0_27 = arith.constant 0 : index
    %c0_28 = arith.constant 0 : index
    %99 = vector.load %arg10[%c2, %c0_27, %c0_28] : memref<8x4x32xf32, #tpu.memory_space<vmem>>, vector<1x4x32xf32>
    %100 = vector.shape_cast %99 : vector<1x4x32xf32> to vector<4x32xf32>
    %101 = vector.shape_cast %95 : vector<4x32xf32> to vector<1x4x32xf32>
    tpu.vector_store %arg10[%c2, %c0_27, %c0_28], %101 {strides = array<i32>} : memref<8x4x32xf32, #tpu.memory_space<vmem>>, vector<1x4x32xf32>,
    %102 = vector.extract_strided_slice %12 {offsets = [12, 0], sizes = [4, 128], strides = [1, 1]} : vector<32x128xf32> to vector<4x128xf32>
    %cst_29 = arith.constant dense<0.000000e+00> : vector<4x128xf32>
    %103 = tpu.matmul %95, %7, %cst_29 {dimension_numbers = #tpu.dot_dimension_numbers<[1], [0], [0], [1], [0, 0, 1, 1], [], []>} : vector<4x32xf32>, vector<32x128xf32>, vector<4x128xf32> -> vector<4x128xf32>
    %104 = arith.addf %102, %103 : vector<4x128xf32>
    %105 = arith.negf %104 : vector<4x128xf32>
    %106 = math.exp %105 : vector<4x128xf32>
    %cst_30 = arith.constant 1.000000e+00 : f32
    %107 = vector.broadcast %cst_30 : f32 to vector<4x128xf32>
    %108 = arith.addf %107, %106 : vector<4x128xf32>
    %109 = arith.divf %107, %108 : vector<4x128xf32>
    %110 = math.tanh %104 : vector<4x128xf32>
    %111 = vector.extract_strided_slice %109 {offsets = [0, 0], sizes = [4, 32], strides = [1, 1]} : vector<4x128xf32> to vector<4x32xf32>
    %112 = vector.extract_strided_slice %109 {offsets = [0, 32], sizes = [4, 32], strides = [1, 1]} : vector<4x128xf32> to vector<4x32xf32>
    %113 = vector.extract_strided_slice %110 {offsets = [0, 64], sizes = [4, 32], strides = [1, 1]} : vector<4x128xf32> to vector<4x32xf32>
    %114 = vector.extract_strided_slice %109 {offsets = [0, 96], sizes = [4, 32], strides = [1, 1]} : vector<4x128xf32> to vector<4x32xf32>
    %115 = arith.mulf %112, %98 : vector<4x32xf32>
    %116 = arith.mulf %111, %113 : vector<4x32xf32>
    %117 = arith.addf %115, %116 : vector<4x32xf32>
    %118 = math.tanh %117 : vector<4x32xf32>
    %119 = arith.mulf %114, %118 : vector<4x32xf32>
    %c3_i32 = arith.constant 3 : i32
    %120 = vector.broadcast %c3_i32 : i32 to vector<4x1xi32>
    %121 = arith.cmpi sgt, %0, %120 : vector<4x1xi32>
    %122 = vector.shape_cast %121 : vector<4x1xi1> to vector<4x1xi1>
    %123 = vector.broadcast %122 : vector<4x1xi1> to vector<4x32xi1>
    %124 = arith.select %123, %119, %95 : vector<4x32xi1>, vector<4x32xf32>
    %125 = vector.shape_cast %121 : vector<4x1xi1> to vector<4x1xi1>
    %126 = vector.broadcast %125 : vector<4x1xi1> to vector<4x32xi1>
    %127 = arith.select %126, %117, %98 : vector<4x32xi1>, vector<4x32xf32>
    %c3 = arith.constant 3 : index
    %c0_31 = arith.constant 0 : index
    %c0_32 = arith.constant 0 : index
    %128 = vector.load %arg10[%c3, %c0_31, %c0_32] : memref<8x4x32xf32, #tpu.memory_space<vmem>>, vector<1x4x32xf32>
    %129 = vector.shape_cast %128 : vector<1x4x32xf32> to vector<4x32xf32>
    %130 = vector.shape_cast %124 : vector<4x32xf32> to vector<1x4x32xf32>
    tpu.vector_store %arg10[%c3, %c0_31, %c0_32], %130 {strides = array<i32>} : memref<8x4x32xf32, #tpu.memory_space<vmem>>, vector<1x4x32xf32>,
    %131 = vector.extract_strided_slice %12 {offsets = [16, 0], sizes = [4, 128], strides = [1, 1]} : vector<32x128xf32> to vector<4x128xf32>
    %cst_33 = arith.constant dense<0.000000e+00> : vector<4x128xf32>
    %132 = tpu.matmul %124, %7, %cst_33 {dimension_numbers = #tpu.dot_dimension_numbers<[1], [0], [0], [1], [0, 0, 1, 1], [], []>} : vector<4x32xf32>, vector<32x128xf32>, vector<4x128xf32> -> vector<4x128xf32>
    %133 = arith.addf %131, %132 : vector<4x128xf32>
    %134 = arith.negf %133 : vector<4x128xf32>
    %135 = math.exp %134 : vector<4x128xf32>
    %cst_34 = arith.constant 1.000000e+00 : f32
    %136 = vector.broadcast %cst_34 : f32 to vector<4x128xf32>
    %137 = arith.addf %136, %135 : vector<4x128xf32>
    %138 = arith.divf %136, %137 : vector<4x128xf32>
    %139 = math.tanh %133 : vector<4x128xf32>
    %140 = vector.extract_strided_slice %138 {offsets = [0, 0], sizes = [4, 32], strides = [1, 1]} : vector<4x128xf32> to vector<4x32xf32>
    %141 = vector.extract_strided_slice %138 {offsets = [0, 32], sizes = [4, 32], strides = [1, 1]} : vector<4x128xf32> to vector<4x32xf32>
    %142 = vector.extract_strided_slice %139 {offsets = [0, 64], sizes = [4, 32], strides = [1, 1]} : vector<4x128xf32> to vector<4x32xf32>
    %143 = vector.extract_strided_slice %138 {offsets = [0, 96], sizes = [4, 32], strides = [1, 1]} : vector<4x128xf32> to vector<4x32xf32>
    %144 = arith.mulf %141, %127 : vector<4x32xf32>
    %145 = arith.mulf %140, %142 : vector<4x32xf32>
    %146 = arith.addf %144, %145 : vector<4x32xf32>
    %147 = math.tanh %146 : vector<4x32xf32>
    %148 = arith.mulf %143, %147 : vector<4x32xf32>
    %c4_i32 = arith.constant 4 : i32
    %149 = vector.broadcast %c4_i32 : i32 to vector<4x1xi32>
    %150 = arith.cmpi sgt, %0, %149 : vector<4x1xi32>
    %151 = vector.shape_cast %150 : vector<4x1xi1> to vector<4x1xi1>
    %152 = vector.broadcast %151 : vector<4x1xi1> to vector<4x32xi1>
    %153 = arith.select %152, %148, %124 : vector<4x32xi1>, vector<4x32xf32>
    %154 = vector.shape_cast %150 : vector<4x1xi1> to vector<4x1xi1>
    %155 = vector.broadcast %154 : vector<4x1xi1> to vector<4x32xi1>
    %156 = arith.select %155, %146, %127 : vector<4x32xi1>, vector<4x32xf32>
    %c4 = arith.constant 4 : index
    %c0_35 = arith.constant 0 : index
    %c0_36 = arith.constant 0 : index
    %157 = vector.load %arg10[%c4, %c0_35, %c0_36] : memref<8x4x32xf32, #tpu.memory_space<vmem>>, vector<1x4x32xf32>
    %158 = vector.shape_cast %157 : vector<1x4x32xf32> to vector<4x32xf32>
    %159 = vector.shape_cast %153 : vector<4x32xf32> to vector<1x4x32xf32>
    tpu.vector_store %arg10[%c4, %c0_35, %c0_36], %159 {strides = array<i32>} : memref<8x4x32xf32, #tpu.memory_space<vmem>>, vector<1x4x32xf32>,
    %160 = vector.extract_strided_slice %12 {offsets = [20, 0], sizes = [4, 128], strides = [1, 1]} : vector<32x128xf32> to vector<4x128xf32>
    %cst_37 = arith.constant dense<0.000000e+00> : vector<4x128xf32>
    %161 = tpu.matmul %153, %7, %cst_37 {dimension_numbers = #tpu.dot_dimension_numbers<[1], [0], [0], [1], [0, 0, 1, 1], [], []>} : vector<4x32xf32>, vector<32x128xf32>, vector<4x128xf32> -> vector<4x128xf32>
    %162 = arith.addf %160, %161 : vector<4x128xf32>
    %163 = arith.negf %162 : vector<4x128xf32>
    %164 = math.exp %163 : vector<4x128xf32>
    %cst_38 = arith.constant 1.000000e+00 : f32
    %165 = vector.broadcast %cst_38 : f32 to vector<4x128xf32>
    %166 = arith.addf %165, %164 : vector<4x128xf32>
    %167 = arith.divf %165, %166 : vector<4x128xf32>
    %168 = math.tanh %162 : vector<4x128xf32>
    %169 = vector.extract_strided_slice %167 {offsets = [0, 0], sizes = [4, 32], strides = [1, 1]} : vector<4x128xf32> to vector<4x32xf32>
    %170 = vector.extract_strided_slice %167 {offsets = [0, 32], sizes = [4, 32], strides = [1, 1]} : vector<4x128xf32> to vector<4x32xf32>
    %171 = vector.extract_strided_slice %168 {offsets = [0, 64], sizes = [4, 32], strides = [1, 1]} : vector<4x128xf32> to vector<4x32xf32>
    %172 = vector.extract_strided_slice %167 {offsets = [0, 96], sizes = [4, 32], strides = [1, 1]} : vector<4x128xf32> to vector<4x32xf32>
    %173 = arith.mulf %170, %156 : vector<4x32xf32>
    %174 = arith.mulf %169, %171 : vector<4x32xf32>
    %175 = arith.addf %173, %174 : vector<4x32xf32>
    %176 = math.tanh %175 : vector<4x32xf32>
    %177 = arith.mulf %172, %176 : vector<4x32xf32>
    %c5_i32 = arith.constant 5 : i32
    %178 = vector.broadcast %c5_i32 : i32 to vector<4x1xi32>
    %179 = arith.cmpi sgt, %0, %178 : vector<4x1xi32>
    %180 = vector.shape_cast %179 : vector<4x1xi1> to vector<4x1xi1>
    %181 = vector.broadcast %180 : vector<4x1xi1> to vector<4x32xi1>
    %182 = arith.select %181, %177, %153 : vector<4x32xi1>, vector<4x32xf32>
    %183 = vector.shape_cast %179 : vector<4x1xi1> to vector<4x1xi1>
    %184 = vector.broadcast %183 : vector<4x1xi1> to vector<4x32xi1>
    %185 = arith.select %184, %175, %156 : vector<4x32xi1>, vector<4x32xf32>
    %c5 = arith.constant 5 : index
    %c0_39 = arith.constant 0 : index
    %c0_40 = arith.constant 0 : index
    %186 = vector.load %arg10[%c5, %c0_39, %c0_40] : memref<8x4x32xf32, #tpu.memory_space<vmem>>, vector<1x4x32xf32>
    %187 = vector.shape_cast %186 : vector<1x4x32xf32> to vector<4x32xf32>
    %188 = vector.shape_cast %182 : vector<4x32xf32> to vector<1x4x32xf32>
    tpu.vector_store %arg10[%c5, %c0_39, %c0_40], %188 {strides = array<i32>} : memref<8x4x32xf32, #tpu.memory_space<vmem>>, vector<1x4x32xf32>,
    %189 = vector.extract_strided_slice %12 {offsets = [24, 0], sizes = [4, 128], strides = [1, 1]} : vector<32x128xf32> to vector<4x128xf32>
    %cst_41 = arith.constant dense<0.000000e+00> : vector<4x128xf32>
    %190 = tpu.matmul %182, %7, %cst_41 {dimension_numbers = #tpu.dot_dimension_numbers<[1], [0], [0], [1], [0, 0, 1, 1], [], []>} : vector<4x32xf32>, vector<32x128xf32>, vector<4x128xf32> -> vector<4x128xf32>
    %191 = arith.addf %189, %190 : vector<4x128xf32>
    %192 = arith.negf %191 : vector<4x128xf32>
    %193 = math.exp %192 : vector<4x128xf32>
    %cst_42 = arith.constant 1.000000e+00 : f32
    %194 = vector.broadcast %cst_42 : f32 to vector<4x128xf32>
    %195 = arith.addf %194, %193 : vector<4x128xf32>
    %196 = arith.divf %194, %195 : vector<4x128xf32>
    %197 = math.tanh %191 : vector<4x128xf32>
    %198 = vector.extract_strided_slice %196 {offsets = [0, 0], sizes = [4, 32], strides = [1, 1]} : vector<4x128xf32> to vector<4x32xf32>
    %199 = vector.extract_strided_slice %196 {offsets = [0, 32], sizes = [4, 32], strides = [1, 1]} : vector<4x128xf32> to vector<4x32xf32>
    %200 = vector.extract_strided_slice %197 {offsets = [0, 64], sizes = [4, 32], strides = [1, 1]} : vector<4x128xf32> to vector<4x32xf32>
    %201 = vector.extract_strided_slice %196 {offsets = [0, 96], sizes = [4, 32], strides = [1, 1]} : vector<4x128xf32> to vector<4x32xf32>
    %202 = arith.mulf %199, %185 : vector<4x32xf32>
    %203 = arith.mulf %198, %200 : vector<4x32xf32>
    %204 = arith.addf %202, %203 : vector<4x32xf32>
    %205 = math.tanh %204 : vector<4x32xf32>
    %206 = arith.mulf %201, %205 : vector<4x32xf32>
    %c6_i32 = arith.constant 6 : i32
    %207 = vector.broadcast %c6_i32 : i32 to vector<4x1xi32>
    %208 = arith.cmpi sgt, %0, %207 : vector<4x1xi32>
    %209 = vector.shape_cast %208 : vector<4x1xi1> to vector<4x1xi1>
    %210 = vector.broadcast %209 : vector<4x1xi1> to vector<4x32xi1>
    %211 = arith.select %210, %206, %182 : vector<4x32xi1>, vector<4x32xf32>
    %212 = vector.shape_cast %208 : vector<4x1xi1> to vector<4x1xi1>
    %213 = vector.broadcast %212 : vector<4x1xi1> to vector<4x32xi1>
    %214 = arith.select %213, %204, %185 : vector<4x32xi1>, vector<4x32xf32>
    %c6 = arith.constant 6 : index
    %c0_43 = arith.constant 0 : index
    %c0_44 = arith.constant 0 : index
    %215 = vector.load %arg10[%c6, %c0_43, %c0_44] : memref<8x4x32xf32, #tpu.memory_space<vmem>>, vector<1x4x32xf32>
    %216 = vector.shape_cast %215 : vector<1x4x32xf32> to vector<4x32xf32>
    %217 = vector.shape_cast %211 : vector<4x32xf32> to vector<1x4x32xf32>
    tpu.vector_store %arg10[%c6, %c0_43, %c0_44], %217 {strides = array<i32>} : memref<8x4x32xf32, #tpu.memory_space<vmem>>, vector<1x4x32xf32>,
    %218 = vector.extract_strided_slice %12 {offsets = [28, 0], sizes = [4, 128], strides = [1, 1]} : vector<32x128xf32> to vector<4x128xf32>
    %cst_45 = arith.constant dense<0.000000e+00> : vector<4x128xf32>
    %219 = tpu.matmul %211, %7, %cst_45 {dimension_numbers = #tpu.dot_dimension_numbers<[1], [0], [0], [1], [0, 0, 1, 1], [], []>} : vector<4x32xf32>, vector<32x128xf32>, vector<4x128xf32> -> vector<4x128xf32>
    %220 = arith.addf %218, %219 : vector<4x128xf32>
    %221 = arith.negf %220 : vector<4x128xf32>
    %222 = math.exp %221 : vector<4x128xf32>
    %cst_46 = arith.constant 1.000000e+00 : f32
    %223 = vector.broadcast %cst_46 : f32 to vector<4x128xf32>
    %224 = arith.addf %223, %222 : vector<4x128xf32>
    %225 = arith.divf %223, %224 : vector<4x128xf32>
    %226 = math.tanh %220 : vector<4x128xf32>
    %227 = vector.extract_strided_slice %225 {offsets = [0, 0], sizes = [4, 32], strides = [1, 1]} : vector<4x128xf32> to vector<4x32xf32>
    %228 = vector.extract_strided_slice %225 {offsets = [0, 32], sizes = [4, 32], strides = [1, 1]} : vector<4x128xf32> to vector<4x32xf32>
    %229 = vector.extract_strided_slice %226 {offsets = [0, 64], sizes = [4, 32], strides = [1, 1]} : vector<4x128xf32> to vector<4x32xf32>
    %230 = vector.extract_strided_slice %225 {offsets = [0, 96], sizes = [4, 32], strides = [1, 1]} : vector<4x128xf32> to vector<4x32xf32>
    %231 = arith.mulf %228, %214 : vector<4x32xf32>
    %232 = arith.mulf %227, %229 : vector<4x32xf32>
    %233 = arith.addf %231, %232 : vector<4x32xf32>
    %234 = math.tanh %233 : vector<4x32xf32>
    %235 = arith.mulf %230, %234 : vector<4x32xf32>
    %c7_i32 = arith.constant 7 : i32
    %236 = vector.broadcast %c7_i32 : i32 to vector<4x1xi32>
    %237 = arith.cmpi sgt, %0, %236 : vector<4x1xi32>
    %238 = vector.shape_cast %237 : vector<4x1xi1> to vector<4x1xi1>
    %239 = vector.broadcast %238 : vector<4x1xi1> to vector<4x32xi1>
    %240 = arith.select %239, %235, %211 : vector<4x32xi1>, vector<4x32xf32>
    %c7 = arith.constant 7 : index
    %c0_47 = arith.constant 0 : index
    %c0_48 = arith.constant 0 : index
    %241 = vector.load %arg10[%c7, %c0_47, %c0_48] : memref<8x4x32xf32, #tpu.memory_space<vmem>>, vector<1x4x32xf32>
    %242 = vector.shape_cast %241 : vector<1x4x32xf32> to vector<4x32xf32>
    %243 = vector.shape_cast %240 : vector<4x32xf32> to vector<1x4x32xf32>
    tpu.vector_store %arg10[%c7, %c0_47, %c0_48], %243 {strides = array<i32>} : memref<8x4x32xf32, #tpu.memory_space<vmem>>, vector<1x4x32xf32>,
    %c0_49 = arith.constant 0 : index
    %c0_50 = arith.constant 0 : index
    %c0_51 = arith.constant 0 : index
    %244 = vector.load %arg10[%c0_49, %c0_50, %c0_51] : memref<8x4x32xf32, #tpu.memory_space<vmem>>, vector<8x4x32xf32>
    %245 = vector.shape_cast %244 : vector<8x4x32xf32> to vector<32x32xf32>
    %c0_52 = arith.constant 0 : index
    %c0_53 = arith.constant 0 : index
    %c0_54 = arith.constant 0 : index
    %246 = vector.load %arg6[%c0_52, %c0_53, %c0_54] : memref<1x32x128xf32, #tpu.memory_space<vmem>>, vector<1x32x128xf32>
    %247 = vector.shape_cast %246 : vector<1x32x128xf32> to vector<32x128xf32>
    %c0_55 = arith.constant 0 : index
    %c0_56 = arith.constant 0 : index
    %c0_57 = arith.constant 0 : index
    %248 = vector.load %arg7[%c0_55, %c0_56, %c0_57] : memref<1x32x128xf32, #tpu.memory_space<vmem>>, vector<1x32x128xf32>
    %249 = vector.shape_cast %248 : vector<1x32x128xf32> to vector<32x128xf32>
    %c0_58 = arith.constant 0 : index
    %c0_59 = arith.constant 0 : index
    %c0_60 = arith.constant 0 : index
    %250 = vector.load %arg8[%c0_58, %c0_59, %c0_60] : memref<1x1x128xf32, #tpu.memory_space<vmem>>, vector<1x1x128xf32>
    %251 = vector.shape_cast %250 : vector<1x1x128xf32> to vector<1x128xf32>
    %cst_61 = arith.constant dense<0.000000e+00> : vector<32x128xf32>
    %252 = tpu.matmul %245, %247, %cst_61 {dimension_numbers = #tpu.dot_dimension_numbers<[1], [0], [0], [1], [0, 0, 1, 1], [], []>} : vector<32x32xf32>, vector<32x128xf32>, vector<32x128xf32> -> vector<32x128xf32>
    %253 = vector.broadcast %251 : vector<1x128xf32> to vector<32x128xf32>
    %254 = arith.addf %252, %253 : vector<32x128xf32>
    %cst_62 = arith.constant 0.000000e+00 : f32
    %255 = vector.broadcast %cst_62 : f32 to vector<4x32xf32>
    %cst_63 = arith.constant 0.000000e+00 : f32
    %256 = vector.broadcast %cst_63 : f32 to vector<4x32xf32>
    %257 = vector.extract_strided_slice %254 {offsets = [0, 0], sizes = [4, 128], strides = [1, 1]} : vector<32x128xf32> to vector<4x128xf32>
    %cst_64 = arith.constant dense<0.000000e+00> : vector<4x128xf32>
    %258 = tpu.matmul %255, %249, %cst_64 {dimension_numbers = #tpu.dot_dimension_numbers<[1], [0], [0], [1], [0, 0, 1, 1], [], []>} : vector<4x32xf32>, vector<32x128xf32>, vector<4x128xf32> -> vector<4x128xf32>
    %259 = arith.addf %257, %258 : vector<4x128xf32>
    %260 = arith.negf %259 : vector<4x128xf32>
    %261 = math.exp %260 : vector<4x128xf32>
    %cst_65 = arith.constant 1.000000e+00 : f32
    %262 = vector.broadcast %cst_65 : f32 to vector<4x128xf32>
    %263 = arith.addf %262, %261 : vector<4x128xf32>
    %264 = arith.divf %262, %263 : vector<4x128xf32>
    %265 = math.tanh %259 : vector<4x128xf32>
    %266 = vector.extract_strided_slice %264 {offsets = [0, 0], sizes = [4, 32], strides = [1, 1]} : vector<4x128xf32> to vector<4x32xf32>
    %267 = vector.extract_strided_slice %264 {offsets = [0, 32], sizes = [4, 32], strides = [1, 1]} : vector<4x128xf32> to vector<4x32xf32>
    %268 = vector.extract_strided_slice %265 {offsets = [0, 64], sizes = [4, 32], strides = [1, 1]} : vector<4x128xf32> to vector<4x32xf32>
    %269 = vector.extract_strided_slice %264 {offsets = [0, 96], sizes = [4, 32], strides = [1, 1]} : vector<4x128xf32> to vector<4x32xf32>
    %270 = arith.mulf %267, %256 : vector<4x32xf32>
    %271 = arith.mulf %266, %268 : vector<4x32xf32>
    %272 = arith.addf %270, %271 : vector<4x32xf32>
    %273 = math.tanh %272 : vector<4x32xf32>
    %274 = arith.mulf %269, %273 : vector<4x32xf32>
    %c0_i32_66 = arith.constant 0 : i32
    %275 = vector.broadcast %c0_i32_66 : i32 to vector<4x1xi32>
    %276 = arith.cmpi sgt, %0, %275 : vector<4x1xi32>
    %277 = vector.shape_cast %276 : vector<4x1xi1> to vector<4x1xi1>
    %278 = vector.broadcast %277 : vector<4x1xi1> to vector<4x32xi1>
    %279 = arith.select %278, %274, %255 : vector<4x32xi1>, vector<4x32xf32>
    %280 = vector.shape_cast %276 : vector<4x1xi1> to vector<4x1xi1>
    %281 = vector.broadcast %280 : vector<4x1xi1> to vector<4x32xi1>
    %282 = arith.select %281, %272, %256 : vector<4x32xi1>, vector<4x32xf32>
    %283 = vector.extract_strided_slice %254 {offsets = [4, 0], sizes = [4, 128], strides = [1, 1]} : vector<32x128xf32> to vector<4x128xf32>
    %cst_67 = arith.constant dense<0.000000e+00> : vector<4x128xf32>
    %284 = tpu.matmul %279, %249, %cst_67 {dimension_numbers = #tpu.dot_dimension_numbers<[1], [0], [0], [1], [0, 0, 1, 1], [], []>} : vector<4x32xf32>, vector<32x128xf32>, vector<4x128xf32> -> vector<4x128xf32>
    %285 = arith.addf %283, %284 : vector<4x128xf32>
    %286 = arith.negf %285 : vector<4x128xf32>
    %287 = math.exp %286 : vector<4x128xf32>
    %cst_68 = arith.constant 1.000000e+00 : f32
    %288 = vector.broadcast %cst_68 : f32 to vector<4x128xf32>
    %289 = arith.addf %288, %287 : vector<4x128xf32>
    %290 = arith.divf %288, %289 : vector<4x128xf32>
    %291 = math.tanh %285 : vector<4x128xf32>
    %292 = vector.extract_strided_slice %290 {offsets = [0, 0], sizes = [4, 32], strides = [1, 1]} : vector<4x128xf32> to vector<4x32xf32>
    %293 = vector.extract_strided_slice %290 {offsets = [0, 32], sizes = [4, 32], strides = [1, 1]} : vector<4x128xf32> to vector<4x32xf32>
    %294 = vector.extract_strided_slice %291 {offsets = [0, 64], sizes = [4, 32], strides = [1, 1]} : vector<4x128xf32> to vector<4x32xf32>
    %295 = vector.extract_strided_slice %290 {offsets = [0, 96], sizes = [4, 32], strides = [1, 1]} : vector<4x128xf32> to vector<4x32xf32>
    %296 = arith.mulf %293, %282 : vector<4x32xf32>
    %297 = arith.mulf %292, %294 : vector<4x32xf32>
    %298 = arith.addf %296, %297 : vector<4x32xf32>
    %299 = math.tanh %298 : vector<4x32xf32>
    %300 = arith.mulf %295, %299 : vector<4x32xf32>
    %c1_i32_69 = arith.constant 1 : i32
    %301 = vector.broadcast %c1_i32_69 : i32 to vector<4x1xi32>
    %302 = arith.cmpi sgt, %0, %301 : vector<4x1xi32>
    %303 = vector.shape_cast %302 : vector<4x1xi1> to vector<4x1xi1>
    %304 = vector.broadcast %303 : vector<4x1xi1> to vector<4x32xi1>
    %305 = arith.select %304, %300, %279 : vector<4x32xi1>, vector<4x32xf32>
    %306 = vector.shape_cast %302 : vector<4x1xi1> to vector<4x1xi1>
    %307 = vector.broadcast %306 : vector<4x1xi1> to vector<4x32xi1>
    %308 = arith.select %307, %298, %282 : vector<4x32xi1>, vector<4x32xf32>
    %309 = vector.extract_strided_slice %254 {offsets = [8, 0], sizes = [4, 128], strides = [1, 1]} : vector<32x128xf32> to vector<4x128xf32>
    %cst_70 = arith.constant dense<0.000000e+00> : vector<4x128xf32>
    %310 = tpu.matmul %305, %249, %cst_70 {dimension_numbers = #tpu.dot_dimension_numbers<[1], [0], [0], [1], [0, 0, 1, 1], [], []>} : vector<4x32xf32>, vector<32x128xf32>, vector<4x128xf32> -> vector<4x128xf32>
    %311 = arith.addf %309, %310 : vector<4x128xf32>
    %312 = arith.negf %311 : vector<4x128xf32>
    %313 = math.exp %312 : vector<4x128xf32>
    %cst_71 = arith.constant 1.000000e+00 : f32
    %314 = vector.broadcast %cst_71 : f32 to vector<4x128xf32>
    %315 = arith.addf %314, %313 : vector<4x128xf32>
    %316 = arith.divf %314, %315 : vector<4x128xf32>
    %317 = math.tanh %311 : vector<4x128xf32>
    %318 = vector.extract_strided_slice %316 {offsets = [0, 0], sizes = [4, 32], strides = [1, 1]} : vector<4x128xf32> to vector<4x32xf32>
    %319 = vector.extract_strided_slice %316 {offsets = [0, 32], sizes = [4, 32], strides = [1, 1]} : vector<4x128xf32> to vector<4x32xf32>
    %320 = vector.extract_strided_slice %317 {offsets = [0, 64], sizes = [4, 32], strides = [1, 1]} : vector<4x128xf32> to vector<4x32xf32>
    %321 = vector.extract_strided_slice %316 {offsets = [0, 96], sizes = [4, 32], strides = [1, 1]} : vector<4x128xf32> to vector<4x32xf32>
    %322 = arith.mulf %319, %308 : vector<4x32xf32>
    %323 = arith.mulf %318, %320 : vector<4x32xf32>
    %324 = arith.addf %322, %323 : vector<4x32xf32>
    %325 = math.tanh %324 : vector<4x32xf32>
    %326 = arith.mulf %321, %325 : vector<4x32xf32>
    %c2_i32_72 = arith.constant 2 : i32
    %327 = vector.broadcast %c2_i32_72 : i32 to vector<4x1xi32>
    %328 = arith.cmpi sgt, %0, %327 : vector<4x1xi32>
    %329 = vector.shape_cast %328 : vector<4x1xi1> to vector<4x1xi1>
    %330 = vector.broadcast %329 : vector<4x1xi1> to vector<4x32xi1>
    %331 = arith.select %330, %326, %305 : vector<4x32xi1>, vector<4x32xf32>
    %332 = vector.shape_cast %328 : vector<4x1xi1> to vector<4x1xi1>
    %333 = vector.broadcast %332 : vector<4x1xi1> to vector<4x32xi1>
    %334 = arith.select %333, %324, %308 : vector<4x32xi1>, vector<4x32xf32>
    %335 = vector.extract_strided_slice %254 {offsets = [12, 0], sizes = [4, 128], strides = [1, 1]} : vector<32x128xf32> to vector<4x128xf32>
    %cst_73 = arith.constant dense<0.000000e+00> : vector<4x128xf32>
    %336 = tpu.matmul %331, %249, %cst_73 {dimension_numbers = #tpu.dot_dimension_numbers<[1], [0], [0], [1], [0, 0, 1, 1], [], []>} : vector<4x32xf32>, vector<32x128xf32>, vector<4x128xf32> -> vector<4x128xf32>
    %337 = arith.addf %335, %336 : vector<4x128xf32>
    %338 = arith.negf %337 : vector<4x128xf32>
    %339 = math.exp %338 : vector<4x128xf32>
    %cst_74 = arith.constant 1.000000e+00 : f32
    %340 = vector.broadcast %cst_74 : f32 to vector<4x128xf32>
    %341 = arith.addf %340, %339 : vector<4x128xf32>
    %342 = arith.divf %340, %341 : vector<4x128xf32>
    %343 = math.tanh %337 : vector<4x128xf32>
    %344 = vector.extract_strided_slice %342 {offsets = [0, 0], sizes = [4, 32], strides = [1, 1]} : vector<4x128xf32> to vector<4x32xf32>
    %345 = vector.extract_strided_slice %342 {offsets = [0, 32], sizes = [4, 32], strides = [1, 1]} : vector<4x128xf32> to vector<4x32xf32>
    %346 = vector.extract_strided_slice %343 {offsets = [0, 64], sizes = [4, 32], strides = [1, 1]} : vector<4x128xf32> to vector<4x32xf32>
    %347 = vector.extract_strided_slice %342 {offsets = [0, 96], sizes = [4, 32], strides = [1, 1]} : vector<4x128xf32> to vector<4x32xf32>
    %348 = arith.mulf %345, %334 : vector<4x32xf32>
    %349 = arith.mulf %344, %346 : vector<4x32xf32>
    %350 = arith.addf %348, %349 : vector<4x32xf32>
    %351 = math.tanh %350 : vector<4x32xf32>
    %352 = arith.mulf %347, %351 : vector<4x32xf32>
    %c3_i32_75 = arith.constant 3 : i32
    %353 = vector.broadcast %c3_i32_75 : i32 to vector<4x1xi32>
    %354 = arith.cmpi sgt, %0, %353 : vector<4x1xi32>
    %355 = vector.shape_cast %354 : vector<4x1xi1> to vector<4x1xi1>
    %356 = vector.broadcast %355 : vector<4x1xi1> to vector<4x32xi1>
    %357 = arith.select %356, %352, %331 : vector<4x32xi1>, vector<4x32xf32>
    %358 = vector.shape_cast %354 : vector<4x1xi1> to vector<4x1xi1>
    %359 = vector.broadcast %358 : vector<4x1xi1> to vector<4x32xi1>
    %360 = arith.select %359, %350, %334 : vector<4x32xi1>, vector<4x32xf32>
    %361 = vector.extract_strided_slice %254 {offsets = [16, 0], sizes = [4, 128], strides = [1, 1]} : vector<32x128xf32> to vector<4x128xf32>
    %cst_76 = arith.constant dense<0.000000e+00> : vector<4x128xf32>
    %362 = tpu.matmul %357, %249, %cst_76 {dimension_numbers = #tpu.dot_dimension_numbers<[1], [0], [0], [1], [0, 0, 1, 1], [], []>} : vector<4x32xf32>, vector<32x128xf32>, vector<4x128xf32> -> vector<4x128xf32>
    %363 = arith.addf %361, %362 : vector<4x128xf32>
    %364 = arith.negf %363 : vector<4x128xf32>
    %365 = math.exp %364 : vector<4x128xf32>
    %cst_77 = arith.constant 1.000000e+00 : f32
    %366 = vector.broadcast %cst_77 : f32 to vector<4x128xf32>
    %367 = arith.addf %366, %365 : vector<4x128xf32>
    %368 = arith.divf %366, %367 : vector<4x128xf32>
    %369 = math.tanh %363 : vector<4x128xf32>
    %370 = vector.extract_strided_slice %368 {offsets = [0, 0], sizes = [4, 32], strides = [1, 1]} : vector<4x128xf32> to vector<4x32xf32>
    %371 = vector.extract_strided_slice %368 {offsets = [0, 32], sizes = [4, 32], strides = [1, 1]} : vector<4x128xf32> to vector<4x32xf32>
    %372 = vector.extract_strided_slice %369 {offsets = [0, 64], sizes = [4, 32], strides = [1, 1]} : vector<4x128xf32> to vector<4x32xf32>
    %373 = vector.extract_strided_slice %368 {offsets = [0, 96], sizes = [4, 32], strides = [1, 1]} : vector<4x128xf32> to vector<4x32xf32>
    %374 = arith.mulf %371, %360 : vector<4x32xf32>
    %375 = arith.mulf %370, %372 : vector<4x32xf32>
    %376 = arith.addf %374, %375 : vector<4x32xf32>
    %377 = math.tanh %376 : vector<4x32xf32>
    %378 = arith.mulf %373, %377 : vector<4x32xf32>
    %c4_i32_78 = arith.constant 4 : i32
    %379 = vector.broadcast %c4_i32_78 : i32 to vector<4x1xi32>
    %380 = arith.cmpi sgt, %0, %379 : vector<4x1xi32>
    %381 = vector.shape_cast %380 : vector<4x1xi1> to vector<4x1xi1>
    %382 = vector.broadcast %381 : vector<4x1xi1> to vector<4x32xi1>
    %383 = arith.select %382, %378, %357 : vector<4x32xi1>, vector<4x32xf32>
    %384 = vector.shape_cast %380 : vector<4x1xi1> to vector<4x1xi1>
    %385 = vector.broadcast %384 : vector<4x1xi1> to vector<4x32xi1>
    %386 = arith.select %385, %376, %360 : vector<4x32xi1>, vector<4x32xf32>
    %387 = vector.extract_strided_slice %254 {offsets = [20, 0], sizes = [4, 128], strides = [1, 1]} : vector<32x128xf32> to vector<4x128xf32>
    %cst_79 = arith.constant dense<0.000000e+00> : vector<4x128xf32>
    %388 = tpu.matmul %383, %249, %cst_79 {dimension_numbers = #tpu.dot_dimension_numbers<[1], [0], [0], [1], [0, 0, 1, 1], [], []>} : vector<4x32xf32>, vector<32x128xf32>, vector<4x128xf32> -> vector<4x128xf32>
    %389 = arith.addf %387, %388 : vector<4x128xf32>
    %390 = arith.negf %389 : vector<4x128xf32>
    %391 = math.exp %390 : vector<4x128xf32>
    %cst_80 = arith.constant 1.000000e+00 : f32
    %392 = vector.broadcast %cst_80 : f32 to vector<4x128xf32>
    %393 = arith.addf %392, %391 : vector<4x128xf32>
    %394 = arith.divf %392, %393 : vector<4x128xf32>
    %395 = math.tanh %389 : vector<4x128xf32>
    %396 = vector.extract_strided_slice %394 {offsets = [0, 0], sizes = [4, 32], strides = [1, 1]} : vector<4x128xf32> to vector<4x32xf32>
    %397 = vector.extract_strided_slice %394 {offsets = [0, 32], sizes = [4, 32], strides = [1, 1]} : vector<4x128xf32> to vector<4x32xf32>
    %398 = vector.extract_strided_slice %395 {offsets = [0, 64], sizes = [4, 32], strides = [1, 1]} : vector<4x128xf32> to vector<4x32xf32>
    %399 = vector.extract_strided_slice %394 {offsets = [0, 96], sizes = [4, 32], strides = [1, 1]} : vector<4x128xf32> to vector<4x32xf32>
    %400 = arith.mulf %397, %386 : vector<4x32xf32>
    %401 = arith.mulf %396, %398 : vector<4x32xf32>
    %402 = arith.addf %400, %401 : vector<4x32xf32>
    %403 = math.tanh %402 : vector<4x32xf32>
    %404 = arith.mulf %399, %403 : vector<4x32xf32>
    %c5_i32_81 = arith.constant 5 : i32
    %405 = vector.broadcast %c5_i32_81 : i32 to vector<4x1xi32>
    %406 = arith.cmpi sgt, %0, %405 : vector<4x1xi32>
    %407 = vector.shape_cast %406 : vector<4x1xi1> to vector<4x1xi1>
    %408 = vector.broadcast %407 : vector<4x1xi1> to vector<4x32xi1>
    %409 = arith.select %408, %404, %383 : vector<4x32xi1>, vector<4x32xf32>
    %410 = vector.shape_cast %406 : vector<4x1xi1> to vector<4x1xi1>
    %411 = vector.broadcast %410 : vector<4x1xi1> to vector<4x32xi1>
    %412 = arith.select %411, %402, %386 : vector<4x32xi1>, vector<4x32xf32>
    %413 = vector.extract_strided_slice %254 {offsets = [24, 0], sizes = [4, 128], strides = [1, 1]} : vector<32x128xf32> to vector<4x128xf32>
    %cst_82 = arith.constant dense<0.000000e+00> : vector<4x128xf32>
    %414 = tpu.matmul %409, %249, %cst_82 {dimension_numbers = #tpu.dot_dimension_numbers<[1], [0], [0], [1], [0, 0, 1, 1], [], []>} : vector<4x32xf32>, vector<32x128xf32>, vector<4x128xf32> -> vector<4x128xf32>
    %415 = arith.addf %413, %414 : vector<4x128xf32>
    %416 = arith.negf %415 : vector<4x128xf32>
    %417 = math.exp %416 : vector<4x128xf32>
    %cst_83 = arith.constant 1.000000e+00 : f32
    %418 = vector.broadcast %cst_83 : f32 to vector<4x128xf32>
    %419 = arith.addf %418, %417 : vector<4x128xf32>
    %420 = arith.divf %418, %419 : vector<4x128xf32>
    %421 = math.tanh %415 : vector<4x128xf32>
    %422 = vector.extract_strided_slice %420 {offsets = [0, 0], sizes = [4, 32], strides = [1, 1]} : vector<4x128xf32> to vector<4x32xf32>
    %423 = vector.extract_strided_slice %420 {offsets = [0, 32], sizes = [4, 32], strides = [1, 1]} : vector<4x128xf32> to vector<4x32xf32>
    %424 = vector.extract_strided_slice %421 {offsets = [0, 64], sizes = [4, 32], strides = [1, 1]} : vector<4x128xf32> to vector<4x32xf32>
    %425 = vector.extract_strided_slice %420 {offsets = [0, 96], sizes = [4, 32], strides = [1, 1]} : vector<4x128xf32> to vector<4x32xf32>
    %426 = arith.mulf %423, %412 : vector<4x32xf32>
    %427 = arith.mulf %422, %424 : vector<4x32xf32>
    %428 = arith.addf %426, %427 : vector<4x32xf32>
    %429 = math.tanh %428 : vector<4x32xf32>
    %430 = arith.mulf %425, %429 : vector<4x32xf32>
    %c6_i32_84 = arith.constant 6 : i32
    %431 = vector.broadcast %c6_i32_84 : i32 to vector<4x1xi32>
    %432 = arith.cmpi sgt, %0, %431 : vector<4x1xi32>
    %433 = vector.shape_cast %432 : vector<4x1xi1> to vector<4x1xi1>
    %434 = vector.broadcast %433 : vector<4x1xi1> to vector<4x32xi1>
    %435 = arith.select %434, %430, %409 : vector<4x32xi1>, vector<4x32xf32>
    %436 = vector.shape_cast %432 : vector<4x1xi1> to vector<4x1xi1>
    %437 = vector.broadcast %436 : vector<4x1xi1> to vector<4x32xi1>
    %438 = arith.select %437, %428, %412 : vector<4x32xi1>, vector<4x32xf32>
    %439 = vector.extract_strided_slice %254 {offsets = [28, 0], sizes = [4, 128], strides = [1, 1]} : vector<32x128xf32> to vector<4x128xf32>
    %cst_85 = arith.constant dense<0.000000e+00> : vector<4x128xf32>
    %440 = tpu.matmul %435, %249, %cst_85 {dimension_numbers = #tpu.dot_dimension_numbers<[1], [0], [0], [1], [0, 0, 1, 1], [], []>} : vector<4x32xf32>, vector<32x128xf32>, vector<4x128xf32> -> vector<4x128xf32>
    %441 = arith.addf %439, %440 : vector<4x128xf32>
    %442 = arith.negf %441 : vector<4x128xf32>
    %443 = math.exp %442 : vector<4x128xf32>
    %cst_86 = arith.constant 1.000000e+00 : f32
    %444 = vector.broadcast %cst_86 : f32 to vector<4x128xf32>
    %445 = arith.addf %444, %443 : vector<4x128xf32>
    %446 = arith.divf %444, %445 : vector<4x128xf32>
    %447 = math.tanh %441 : vector<4x128xf32>
    %448 = vector.extract_strided_slice %446 {offsets = [0, 0], sizes = [4, 32], strides = [1, 1]} : vector<4x128xf32> to vector<4x32xf32>
    %449 = vector.extract_strided_slice %446 {offsets = [0, 32], sizes = [4, 32], strides = [1, 1]} : vector<4x128xf32> to vector<4x32xf32>
    %450 = vector.extract_strided_slice %447 {offsets = [0, 64], sizes = [4, 32], strides = [1, 1]} : vector<4x128xf32> to vector<4x32xf32>
    %451 = arith.mulf %449, %438 : vector<4x32xf32>
    %452 = arith.mulf %448, %450 : vector<4x32xf32>
    %453 = arith.addf %451, %452 : vector<4x32xf32>
    %c7_i32_87 = arith.constant 7 : i32
    %454 = vector.broadcast %c7_i32_87 : i32 to vector<4x1xi32>
    %455 = arith.cmpi sgt, %0, %454 : vector<4x1xi32>
    %456 = vector.shape_cast %455 : vector<4x1xi1> to vector<4x1xi1>
    %457 = vector.broadcast %456 : vector<4x1xi1> to vector<4x32xi1>
    %458 = arith.select %457, %453, %438 : vector<4x32xi1>, vector<4x32xf32>
    %c0_88 = arith.constant 0 : index
    %c0_89 = arith.constant 0 : index
    %c0_90 = arith.constant 0 : index
    %459 = vector.load %arg9[%c0_88, %c0_89, %c0_90] : memref<1x4x32xf32, #tpu.memory_space<vmem>>, vector<1x4x32xf32>
    %460 = vector.shape_cast %459 : vector<1x4x32xf32> to vector<4x32xf32>
    %461 = vector.shape_cast %458 : vector<4x32xf32> to vector<1x4x32xf32>
    tpu.vector_store %arg9[%c0_88, %c0_89, %c0_90], %461 {strides = array<i32>} : memref<1x4x32xf32, #tpu.memory_space<vmem>>, vector<1x4x32xf32>,
    return
  }
  func.func @transform_0(%arg0: i32) -> (i32, i32) {
    %c0_i32 = arith.constant 0 : i32
    %c0_i32_0 = arith.constant 0 : i32
    %c0_i32_1 = arith.constant 0 : i32
    return %c0_i32, %c0_i32_0 : i32, i32
  }
  func.func @transform_1(%arg0: i32) -> (i32, i32, i32, i32) {
    %c0_i32 = arith.constant 0 : i32
    %c0_i32_0 = arith.constant 0 : i32
    %c0_i32_1 = arith.constant 0 : i32
    %c0_i32_2 = arith.constant 0 : i32
    return %arg0, %c0_i32, %c0_i32_0, %c0_i32_1 : i32, i32, i32, i32
  }
  func.func @transform_2(%arg0: i32) -> (i32, i32, i32) {
    %c0_i32 = arith.constant 0 : i32
    %c0_i32_0 = arith.constant 0 : i32
    %c0_i32_1 = arith.constant 0 : i32
    return %arg0, %c0_i32, %c0_i32_0 : i32, i32, i32
  }
  func.func @transform_3(%arg0: i32) -> (i32, i32, i32) {
    %c0_i32 = arith.constant 0 : i32
    %c0_i32_0 = arith.constant 0 : i32
    %c0_i32_1 = arith.constant 0 : i32
    return %arg0, %c0_i32, %c0_i32_0 : i32, i32, i32
  }
  func.func @transform_4(%arg0: i32) -> (i32, i32, i32) {
    %c0_i32 = arith.constant 0 : i32
    %c0_i32_0 = arith.constant 0 : i32
    %c0_i32_1 = arith.constant 0 : i32
    return %arg0, %c0_i32, %c0_i32_0 : i32, i32, i32
  }
  func.func @transform_5(%arg0: i32) -> (i32, i32, i32) {
    %c0_i32 = arith.constant 0 : i32
    %c0_i32_0 = arith.constant 0 : i32
    %c0_i32_1 = arith.constant 0 : i32
    return %arg0, %c0_i32, %c0_i32_0 : i32, i32, i32
  }
  func.func @transform_6(%arg0: i32) -> (i32, i32, i32) {
    %c0_i32 = arith.constant 0 : i32
    %c0_i32_0 = arith.constant 0 : i32
    %c0_i32_1 = arith.constant 0 : i32
    return %arg0, %c0_i32, %c0_i32_0 : i32, i32, i32
  }
  func.func @transform_7(%arg0: i32) -> (i32, i32, i32) {
    %c0_i32 = arith.constant 0 : i32
    %c0_i32_0 = arith.constant 0 : i32
    %c0_i32_1 = arith.constant 0 : i32
    return %arg0, %c0_i32, %c0_i32_0 : i32, i32, i32
  }
  func.func @transform_8(%arg0: i32) -> (i32, i32, i32) {
    %c0_i32 = arith.constant 0 : i32
    %c0_i32_0 = arith.constant 0 : i32
    %c0_i32_1 = arith.constant 0 : i32
    return %arg0, %c0_i32, %c0_i32_0 : i32, i32, i32
  }
}

</mosaic_0001>

<bundles_post_ra>
// kernel: tpu_custom_call.1
= control target key start
LH: loop header
LB: loop body
LE: loop exit
PB: predicated region body
PF: predicated region fallthrough
CT: control target
= control target key end

     0   :  { %s3369_s0 = inlined_call_operand.vmem [shape: s32[4,1], index: 0, kind: input, shape index: {}]   ;;  %s3370_s1 = inlined_call_operand.hbm [shape: f32[2,8,4,32], index: 1, kind: input, shape index: {}]   ;;  %s3371_s2 = inlined_call_operand.hbm [shape: f32[2,32,128], index: 2, kind: input, shape index: {}]   ;;  %s3372_s3 = inlined_call_operand.hbm [shape: f32[2,32,128], index: 3, kind: input, shape index: {}]   ;;  %s3373_s4 = inlined_call_operand.vmem [shape: f32[2,1,128], index: 4, kind: input, shape index: {}]   ;;  %s3374_s5 = inlined_call_operand.hbm [shape: f32[2,32,128], index: 5, kind: input, shape index: {}]   ;;  %s3375_s6 = inlined_call_operand.hbm [shape: f32[2,32,128], index: 6, kind: input, shape index: {}]   ;;  %s3376_s7 = inlined_call_operand.vmem [shape: f32[2,1,128], index: 7, kind: input, shape index: {}]   ;;  %s3377_s8 = inlined_call_operand.hbm [shape: f32[2,4,32], index: 8, kind: output, shape index: {}]  }
   0x1   :  { %3394 = sst [smem:[#allocation24_spill]] %s3371_s2 }
   0x2   :  { %3395 = sst [smem:[#allocation25_spill]] %s3374_s5 }
   0x3   :  { %3396 = sst [smem:[#allocation26_spill]] %s3376_s7 }
   0x4   :  { %3397 = sst [smem:[#allocation27_spill]] %s3377_s8 }
   0x5   :  { %13 = vsyncpa [#allocation4], 0 }
   0x6   :  { %15 = vsyncpa [#allocation4 + $0x1], 0 }
   0x7   :  { %16 = vsyncpa [#allocation7], 0 }
   0x8   :  { %18 = vsyncpa [#allocation7 + $0x1], 0 }
   0x9   :  { %19 = vsyncpa [#allocation10], 0 }
   0xa   :  { %21 = vsyncpa [#allocation10 + $0x1], 0 }
   0xb   :  { %22 = vsyncpa [#allocation5], 0 }
   0xc   :  { %24 = vsyncpa [#allocation5 + $0x1], 0  ;;  %s2701_s27 = smov 0   ;;  %s2703_s28 = smov 0  }
   0xd   :  { %s2705_s29 = smov 0   ;;  %s2707_s30 = smov 0  }
   0xe LB: > { %3398 = sst [smem:[#allocation17_spill]] %s2633_s27  ;;  %s2722_s9 = sadd.s32 4294967295, %s2645_s30   ;;  %s2645_s30 = sphi %s2707_s30, %s3423_s30   ;;  %s2641_s29 = sphi %s2705_s29, %s3425_s29   ;;  %s2637_s28 = sphi %s2703_s28, %s3427_s28   ;;  %s2633_s27 = sphi %s2701_s27, %s3426_s27  }
   0xf   : > { %3399 = sst [smem:[#allocation18_spill]] %s2641_s29  ;;  %s2142_s10 = sadd.s32 4294967294, %s2645_s30  }
  0x10   : > { %3400 = sst [smem:[#allocation19_spill]] %s2645_s30  ;;  %s2726_s11 = sadd.s32 1, %s2645_s30  }
  0x11   : > { %3401 = sst [smem:[#allocation20_spill]] %s2726_s11  ;;  %s58_s12 = sadd.s32 1, %s2641_s29 }
  0x12   : > { %s55_s13 = ssub.s32 %s2645_s30, %s2726_s11  ;;  %p65_p0 = scmp.ne.s32.totalorder %s2641_s29, %s2637_s28 }
  0x13   : > { %p56_p1 = scmp.eq.s32.totalorder %s55_s13, 0  ;;  %p66_p2 = scmp.eq.s32.totalorder %s2645_s30, 0 }
  0x14   : > { %p71_p3 = scmp.ne.s32.totalorder %s2637_s28, %s2633_s27  ;;  %p72_p4 = scmp.eq.s32.totalorder %s2722_s9, 0 }
  0x15   : > { %s2738_s14 = scalar_select %p56_p1, %s2641_s29, %s58_s12  }
  0x16   : > { %p67_p5 = por %p66_p2, %p65_p0  ;;  %p2740_p6 = por %p72_p4, %p71_p3 }
  0x17   : > { %3402 = sst [smem:[#allocation21_spill]] %s2738_s14  ;;  %p251_p7 = scmp.eq.s32.totalorder %s2722_s9, 1 }
  0x18   : > { %p257_p8 = scmp.eq.s32.totalorder %s2142_s10, 1  ;;  %p2144_p9 = scmp.ge.s32.totalorder %s2645_s30, 2 }
  0x19   : > { %p2246_p10 = scmp.lt.s32.totalorder %s2645_s30, 2  ;;  %p2747_p11 = por %p251_p7, %p65_p0 }
  0x1a   : > { %p2751_p12 = por %p257_p8, %p71_p3  ;;  %s3378_s18 = sand.u32 1, %s2641_s29  }
  0x1b   : > { %s3404_s16 = scalar_select %p2747_p11, 1, 0 }
  0x1c   : > { %s3406_s17 = scalar_select %p2751_p12, 1, 0 }
  0x1d   : > { %3405 = sst [smem:[#allocation22_spill]] %s3404_s16  ;;  %s2757_s19 = sshll.u32 %s2645_s30, 5 }
  0x1e   : > { %3407 = sst [smem:[#allocation23_spill]] %s3406_s17  ;;  %s2761_s20 = sshll.u32 %s3378_s18, 5 }
  0x1f   : > { %p2763_p13 = pnand %p2246_p10, %p67_p5  ;;  %s3381_s22 = sand.u32 1, %s2645_s30  }
  0x20   : > { %s3409_s2 = sld [smem:[#allocation24_spill]]  ;;  %s306_s26 = scalar_lea.vmem [#allocation6], %s2761_s20 }
  0x21   : > { %s314_s10 = sshll.u32 %s306_s26, 4  ;;  %p2160_p0 = scmp.ge.s32.totalorder %s2645_s30, 1  ;;  %s315_s10 = int_to_ptr.vmem [resolvable:$true] %s314_s10 }
  0x22   : > { %s2776_s13 = scalar_lea.sflag [#allocation7], %s3381_s22  ;;  %p2780_p2 = pneg %p2763_p13 }
  0x26   : > { %s311_s25 = scalar_lea.hbm %s3409_s2, %s2757_s19 }
  0x27   : > { %s312_s12 = sshll.u32 %s311_s25, 4  ;;  %s2428_s25 = scalar_lea.hbm %s3409_s2, 64  ;;  %s313_s12 = int_to_ptr.hbm [resolvable:$true] %s312_s12 }
  0x28   : > { %s2421_s18 = sshra.s32 %s313_s12, 4  ;;  %s2422_s18 = int_to_ptr.hbm [resolvable:$true] %s2421_s18 }
  0x29   : > { %s2423_s14 = scalar_lea.hbm %s2422_s18, 32  ;;  %p2429_p5 = scmp.lt.s32.totalorder %s2422_s18, %s3409_s2 }
  0x2a   : > { %p2424_p1 = scmp.ne.s32.totalorder %s2422_s18, %s2423_s14  ;;  %p2430_p7 = scmp.lt.s32.totalorder %s2428_s25, %s2423_s14 }
  0x2c   : > { %p2426_p3 = pnand %p2780_p2, %p2424_p1  ;;  %p2431_p8 = por %p2430_p7, %p2429_p5 }
  0x2e   : > { %p2427_p4 = pneg %p2426_p3 }
  0x30   : > { %p2432_p10 = pnand %p2431_p8, %p2427_p4 }
  0x32   : > { %2435 = shalt.err (!%p2432_p10)
}
  0x33   : > { %s3387_s17 = smov 128   ;;  %s3391_s27 = smov 8  }
  0x34   : > { %2232 = dma.hbm_to_vmem [thread:$0]  (!%p2763_p13), %s313_s12, 512, %s315_s10, %s2776_s13, %s3387_s17, %s3387_s17, %s3391_s27  }
  0x35   : > { %p400_p1 = scmp.lt.s32.totalorder %s2645_s30, 3  ;;  %s3411_s5 = sld [smem:[#allocation25_spill]] }
  0x36   : > { %s356_s25 = scalar_lea.vmem [#allocation9], %s2761_s20  ;;  %s3413_s2 = sand.u32 1, %s2645_s30  }
  0x37   : > { %p2805_p3 = pnand %p2160_p0, %p400_p1  ;;  %s364_s26 = sshll.u32 %s356_s25, 4  ;;  %s365_s26 = int_to_ptr.vmem [resolvable:$true] %s364_s26 }
  0x38   : > { %s2812_s16 = scalar_lea.sflag [#allocation10], %s3413_s2 }
  0x3b   : > { %s361_s22 = scalar_lea.hbm %s3411_s5, %s2757_s19  ;;  %s2458_s18 = scalar_lea.hbm %s3411_s5, 64 }
  0x3c   : > { %s362_s24 = sshll.u32 %s361_s22, 4  ;;  %s363_s24 = int_to_ptr.hbm [resolvable:$true] %s362_s24 }
  0x3d   : > { %s2451_s8 = sshra.s32 %s363_s24, 4  ;;  %s2452_s8 = int_to_ptr.hbm [resolvable:$true] %s2451_s8 }
  0x3e   : > { %s2453_s10 = scalar_lea.hbm %s2452_s8, 32  ;;  %p2459_p0 = scmp.lt.s32.totalorder %s2452_s8, %s3411_s5 }
  0x3f   : > { %p2454_p4 = scmp.ne.s32.totalorder %s2452_s8, %s2453_s10  ;;  %p2460_p8 = scmp.lt.s32.totalorder %s2458_s18, %s2453_s10 }
  0x41   : > { %p2456_p5 = pnand %p2454_p4, %p2780_p2  ;;  %p2461_p10 = por %p2460_p8, %p2459_p0 }
  0x43   : > { %p2457_p7 = pneg %p2456_p5 }
  0x45   : > { %p2462_p1 = pnand %p2461_p10, %p2457_p7 }
  0x47   : > { %2465 = shalt.err (!%p2462_p1)
}
  0x48   : > { %s3414_s2 = smov 128   ;;  %s289_s17 = scalar_lea.hbm %s3370_s1, %s2757_s19 }
  0x49   : > { %2238 = dma.hbm_to_vmem [thread:$0]  (!%p2763_p13), %s363_s24, 512, %s365_s26, %s2812_s16, %s3414_s2, %s3414_s2, %s3391_s27  }
  0x4a   : > { %s290_s8 = sshll.u32 %s289_s17, 4  ;;  %s284_s10 = scalar_lea.vmem [#allocation3], %s2761_s20  ;;  %s291_s8 = int_to_ptr.hbm [resolvable:$true] %s290_s8 }
  0x4b   : > { %s292_s14 = sshll.u32 %s284_s10, 4  ;;  %s3415_s18 = sand.u32 1, %s2641_s29   ;;  %s293_s14 = int_to_ptr.vmem [resolvable:$true] %s292_s14 }
  0x4c   : > { %s281_s22 = scalar_lea.sflag [#allocation4], %s3415_s18  ;;  %s2481_s5 = sshra.s32 %s291_s8, 4  ;;  %s2482_s5 = int_to_ptr.hbm [resolvable:$true] %s2481_s5 }
  0x4d   : > { %s2483_s30 = scalar_lea.hbm %s2482_s5, 32  ;;  %s2488_s26 = scalar_lea.hbm %s3370_s1, 64 }
  0x4e   : > { %p2484_p4 = scmp.ne.s32.totalorder %s2482_s5, %s2483_s30  ;;  %p2489_p0 = scmp.lt.s32.totalorder %s2482_s5, %s3370_s1 }
  0x4f   : > { %p2490_p8 = scmp.lt.s32.totalorder %s2488_s26, %s2483_s30 }
  0x50   : > { %p2486_p5 = pnand %p2484_p4, %p2780_p2 }
  0x51   : > { %p2491_p10 = por %p2490_p8, %p2489_p0 }
  0x52   : > { %p2487_p7 = pneg %p2486_p5 }
  0x54   : > { %p2492_p1 = pnand %p2491_p10, %p2487_p7 }
  0x56   : > { %2495 = shalt.err (!%p2492_p1)
}
  0x57   : > { %s2649_s17 = smov 64   ;;  %s2650_s10 = smov 4  }
  0x58   : > { %2229 = dma.hbm_to_vmem [thread:$0]  (!%p2763_p13), %s291_s8, 512, %s293_s14, %s281_s22, %s2649_s17, %s2649_s17, %s2650_s10  }
  0x59   : > { %s333_s7 = scalar_lea.hbm %s3372_s3, %s2757_s19  ;;  %s328_s29 = scalar_lea.vmem [#allocation8], %s2761_s20 }
  0x5a   : > { %s334_s24 = sshll.u32 %s333_s7, 4  ;;  %s336_s25 = sshll.u32 %s328_s29, 4  ;;  %s335_s24 = int_to_ptr.hbm [resolvable:$true] %s334_s24  ;;  %s337_s25 = int_to_ptr.vmem [resolvable:$true] %s336_s25 }
  0x5b   : > { %s2511_s5 = sshra.s32 %s335_s24, 4  ;;  %s2518_s8 = scalar_lea.hbm %s3372_s3, 64  ;;  %s2512_s5 = int_to_ptr.hbm [resolvable:$true] %s2511_s5 }
  0x5c   : > { %s2513_s30 = scalar_lea.hbm %s2512_s5, 32  ;;  %p2519_p0 = scmp.lt.s32.totalorder %s2512_s5, %s3372_s3 }
  0x5d   : > { %p2514_p4 = scmp.ne.s32.totalorder %s2512_s5, %s2513_s30  ;;  %p2520_p8 = scmp.lt.s32.totalorder %s2518_s8, %s2513_s30 }
  0x5f   : > { %p2516_p5 = pnand %p2514_p4, %p2780_p2  ;;  %p2521_p10 = por %p2520_p8, %p2519_p0 }
  0x61   : > { %p2517_p7 = pneg %p2516_p5 }
  0x63   : > { %p2522_p1 = pnand %p2521_p10, %p2517_p7 }
  0x65   : > { %2525 = shalt.err (!%p2522_p1)
}
  0x66   : > { %s3416_s27 = smov 8   ;;  %s383_s10 = scalar_lea.hbm %s3375_s6, %s2757_s19 }
  0x67   : > { %2235 = dma.hbm_to_vmem [thread:$0]  (!%p2763_p13), %s335_s24, 512, %s337_s25, %s2776_s13, %s3414_s2, %s3414_s2, %s3416_s27  }
  0x68   : > { %s384_s18 = sshll.u32 %s383_s10, 4  ;;  %s378_s7 = scalar_lea.vmem [#allocation11], %s2761_s20  ;;  %s385_s18 = int_to_ptr.hbm [resolvable:$true] %s384_s18 }
  0x69   : > { %s386_s5 = sshll.u32 %s378_s7, 4  ;;  %s2541_s30 = sshra.s32 %s385_s18, 4  ;;  %s387_s5 = int_to_ptr.vmem [resolvable:$true] %s386_s5  ;;  %s2542_s30 = int_to_ptr.hbm [resolvable:$true] %s2541_s30 }
  0x6a   : > { %s2543_s26 = scalar_lea.hbm %s2542_s30, 32  ;;  %s2548_s13 = scalar_lea.hbm %s3375_s6, 64 }
  0x6b   : > { %p2544_p4 = scmp.ne.s32.totalorder %s2542_s30, %s2543_s26  ;;  %p2549_p0 = scmp.lt.s32.totalorder %s2542_s30, %s3375_s6 }
  0x6c   : > { %p2550_p8 = scmp.lt.s32.totalorder %s2548_s13, %s2543_s26 }
  0x6d   : > { %p2546_p5 = pnand %p2544_p4, %p2780_p2 }
  0x6e   : > { %p2551_p10 = por %p2550_p8, %p2549_p0 }
  0x6f   : > { %p2547_p7 = pneg %p2546_p5 }
  0x71   : > { %p2552_p1 = pnand %p2551_p10, %p2547_p7 }
  0x73   : > { %2555 = shalt.err (!%p2552_p1)
}
  0x74   : > { %2241 = dma.hbm_to_vmem [thread:$0]  (!%p2763_p13), %s385_s18, 512, %s387_s5, %s2812_s16, %s3414_s2, %s3414_s2, %s3416_s27  }
  0x75   : > { %404 = sbr.rel (%p2805_p3) target bundleno = 8249 (0x2039), region = 52  ;;  %s2886_s11 = sand.u32 (!%p2805_p3), 1, %s2637_s28  }
  0x76   : > { %s2889_s19 = sshll.u32 (!%p2805_p3), %s2886_s11, 5  ;;  %s407_s20 = scalar_lea.sflag (!%p2805_p3), [#allocation4], %s2886_s11 }
  0x77   : > { %s2893_s14 = scalar_lea.vmem (!%p2805_p3), [#allocation3], %s2889_s19 }
  0x7a   : > { %2616 = dma.done.wait (%p2740_p6), %s407_s20, 512  }
  0x7b   : > { %2618 = vsyncadd (%p2740_p6), %s407_s20, 4294966784  ;;  %s416_s16 = sand.u32 1, %s2722_s9   ;;  %s420_s23 = scalar_lea.vmem [#allocation6], %s2889_s19 }
  0x7c   : > { %s417_s21 = scalar_lea.sflag [#allocation7], %s416_s16 }
  0x7d   : > { %2620 = dma.done.wait (%p2740_p6), %s417_s21, 1024  }
  0x7e   : > { %2622 = vsyncadd (%p2740_p6), %s417_s21, 4294966272  ;;  %s430_s2 = scalar_lea.vmem [#allocation8], %s2889_s19  ;;  %s437_s22 = scalar_lea.sflag [#allocation10], %s416_s16 }
  0x7f   : > { %s2907_s27 = scalar_lea.vmem [#allocation9], %s2889_s19 }
  0x80   : > { %2624 = dma.done.wait (%p2740_p6), %s437_s22, 1024  }
  0x81   : > { %2626 = vsyncadd (%p2740_p6), %s437_s22, 4294966272  ;;  %p510_p13 = scmp.lt.s32.totalorder %s2722_s9, 1  ;;  %v528_v0 = vld [vmem:[%s420_s23 + $0x18] sm:$0xff]  ;;  %v527_v1 = vld [vmem:[%s420_s23 + $0x10] sm:$0xff]  ;;  %v2651_v10 = vmov 0.0   ;;  %vm564_vm0 = vcmask 261120  }
  0x82   : > { %v2917_v2 = vld [vmem:[%s430_s2 + $0x18] sm:$0xff]  ;;  %585 = vmatpush.msra.mxu0 %v528_v0  ;;  %v526_v3 = vld [vmem:[%s420_s23 + $0x8] sm:$0xff]  ;;  %v2920_v4 = vld [vmem:[%s430_s2 + $0x10] sm:$0xff]  ;;  %s2652_s5 = smov 64   ;;  %s2653_s30 = smov 32   ;;  %v2654_v33 = vmov 0  }
  0x83   : > { %s2915_s29 = scalar_select %p510_p13, %s2722_s9, 1  ;;  %617 = vmatpush.msra.mxu1 %v2917_v2  ;;  %v2922_v5 = vld [vmem:[%s430_s2 + $0x8] sm:$0xff]  ;;  %v517_v6 = vld [vmem:[%s2893_s14] sm:$0xf]  ;;  %v518_v7 = vld [vmem:[%s2893_s14 + $0x4] sm:$0xf]  ;;  %691 = vmatpush.msra.mxu2 %v2917_v2 }
  0x84   : > { %781 = vmatpush.msra.mxu3 %v2917_v2  ;;  %586 = vmatpush.msra.mxu0 %v527_v1  ;;  %545 = vst [vmem:[#allocation1] ss:$2 sm:$0xff] %v517_v6  ;;  %v525_v8 = vld [vmem:[%s420_s23] sm:$0xff]  ;;  %v2977_v38 = vld [vmem:[%s3369_s0] sm:$0xf]  ;;  %vm675_vm7 = vcmask 257024  }
  0x85   : > { %s512_s10 = scalar_lea.vmem %s3373_s4, %s2915_s29  ;;  %618 = vmatpush.msra.mxu1 %v2920_v4  ;;  %547 = vst [vmem:[#allocation1 + $0x1] ss:$2 sm:$0xff] %v518_v7  ;;  %v2933_v9 = vld [vmem:[%s430_s2] sm:$0xff]  ;;  %692 = vmatpush.msra.mxu2 %v2920_v4  ;;  %vm663_vm5 = vcmp.gt.s32.totalorder %v2977_v38, 0  ;;  %vm743_vm8 = vcmp.gt.s32.totalorder %v2977_v38, 1  ;;  %s2655_s8 = smov 96  }
  0x86   : > { %782 = vmatpush.msra.mxu3 %v2920_v4  ;;  %587 = vmatpush.msra.mxu0 %v526_v3  ;;  %v2966_v12 = vld [vmem:[%s512_s10] ss:$0 sm:$0xff]  ;;  %v664_v39 = vsel %vm663_vm5, 1, %v2654_v33  ;;  %v744_v50 = vsel %vm743_vm8, 1, %v2654_v33  ;;  %vm831_vm14 = vcmp.gt.s32.totalorder %v2977_v38, 2  ;;  %vm914_vm5 = vcmp.gt.s32.totalorder %v2977_v38, 3 }
  0x87   : > { %619 = vmatpush.msra.mxu1 %v2922_v5  ;;  %693 = vmatpush.msra.mxu2 %v2922_v5  ;;  %s3417_s25 = sld [smem:[#allocation26_spill]]  ;;  %s2166_s2 = sshll.u32 %s2886_s11, 2 }
  0x88   : > { %783 = vmatpush.msra.mxu3 %v2922_v5  ;;  %588 = vmatpush.msra.mxu0 %v525_v8  ;;  %s2206_s22 = sshll.u32 %s2722_s9, 2  ;;  %s3418_s15 = sld [smem:[#allocation27_spill]] }
  0x89   : > { %620 = vmatpush.msra.mxu1 %v2933_v9  ;;  %694 = vmatpush.msra.mxu2 %v2933_v9  ;;  %s509_s18 = scalar_lea.vmem [#allocation12], %s2166_s2 }
  0x8a   : > { %621 = vmatmul.f32.vlgmr.msra.gmra.mxu1 %v2651_v10  ;;  %784 = vmatpush.msra.mxu3 %v2933_v9  ;;  %s1965_s7 = sshll.u32 %s509_s18, 4  ;;  %s1966_s7 = int_to_ptr.vmem [resolvable:$true] %s1965_s7 }
  0x8b   : > { %862 = vmatpush.msrb.mxu1 %v2917_v2  ;;  %952 = vmatpush.msrb.mxu2 %v2917_v2 }
  0x8c   : > { %1033 = vmatpush.msrb.mxu3 %v2917_v2  ;;  %v560_v11 = vld.sshfl [vmem:[#allocation1] sm:$0xff pattern:$0x75316420]  ;;  %2289 = vset.pattern.permute.xlu1 %v2654_v33 }
  0x8d   : > { %863 = vmatpush.msrb.mxu1 %v2920_v4  ;;  %2167 = vmatmul.msk.f32.vlgmr.msra.gmra.mxu0 %vm564_vm0, %v560_v11  ;;  %s515_s20 = scalar_lea.vmem %s3417_s25, %s2915_s29 }
  0x8e   : > { %953 = vmatpush.msrb.mxu2 %v2920_v4  ;;  %1034 = vmatpush.msrb.mxu3 %v2920_v4  ;;  %s1963_s10 = scalar_lea.hbm %s3418_s15, %s2206_s22  ;;  %s2591_s13 = scalar_lea.hbm %s3418_s15, 8 }
  0x8f   : > { %864 = vmatpush.msrb.mxu1 %v2922_v5  ;;  %2290 = vset.pattern.permute.xlu2 %v2654_v33 }
  0x90   : > { %954 = vmatpush.msrb.mxu2 %v2922_v5  ;;  %1035 = vmatpush.msrb.mxu3 %v2922_v5 }
  0x91   : > { %865 = vmatpush.msrb.mxu1 %v2933_v9  ;;  %2291 = vset.pattern.permute.xlu0 %v2654_v33 }
  0x92   : > { %955 = vmatpush.msrb.mxu2 %v2933_v9  ;;  %1036 = vmatpush.msrb.mxu3 %v2933_v9 }
  0x93   : > { %1123 = vmatpush.msra.mxu1 %v2917_v2 }
  0x95   : > { %1124 = vmatpush.msra.mxu1 %v2920_v4 }
  0x97   : > { %1125 = vmatpush.msra.mxu1 %v2922_v5 }
  0x99   : > { %1126 = vmatpush.msra.mxu1 %v2933_v9 }
 0x107   : > { %v622_v14 = vpop.f32.mrf.mxu1 }
 0x10a   : > { %v590_v13 = vpop.f32.mrf.mxu0 }
 0x10b   : > { %v591_v15 = vadd.f32 %v2966_v12, %v590_v13 }
 0x10d   : > { %v625_v16 = vadd.f32 %v622_v14, %v591_v15 }
 0x10f   : > { %2294 = vtanh.f32 %v625_v16  ;;  %v2171_v18 = vmul.f32 -1.442695, %v625_v16 }
 0x111   : > { %2296 = vpow2.f32 %v2171_v18  ;;  %v832_v18 = vsel %vm831_vm14, 1, %v2654_v33  ;;  %vm1002_vm14 = vcmp.gt.s32.totalorder %v2977_v38, 4 }
 0x115   : > { %v2295_v17 = vpop.eup %2294 }
 0x116   : > { %648 = vrot.lane.b32.xlu0 %v2295_v17, %s2652_s5 }
 0x117   : > { %v2297_v19 = vpop.eup %2296 }
 0x118   : > { %v629_v20 = vadd.f32 1.0, %v2297_v19  ;;  %v519_v19 = vld [vmem:[%s2893_s14 + $0x8] sm:$0xf] }
 0x119   : > { %549 = vst [vmem:[#allocation1 + $0x10] ss:$2 sm:$0xff] %v519_v19 }
 0x11a   : > { %2298 = vrcp.f32 %v629_v20  ;;  %v641_v26 = vand.u32 2147483648, %v629_v20  ;;  %vm635_vm2 = vweird.f32 %v629_v20  ;;  %v639_v27 = vand.u32 2147483647, %v629_v20 }
 0x11c   : > { %v642_v29 = vor.u32 1.1754944e-38, %v641_v26  ;;  %vm640_vm4 = vcmp.eq.f32.partialorder %v639_v27, 8.507059e+37 }
 0x120   : > { %v2299_v21 = vpop.eup %2298 }
 0x121   : > { %v631_v22 = vmul.f32 %v2299_v21, %v629_v20  ;;  %vm636_vm1 = vweird.f32 %v2299_v21  ;;  %v520_v20 = vld [vmem:[%s2893_s14 + $0xc] sm:$0xf] }
 0x122   : > { %vm637_vm3 = vmor %vm635_vm2, %vm636_vm1  ;;  %551 = vst [vmem:[#allocation1 + $0x11] ss:$2 sm:$0xff] %v520_v20 }
 0x123   : > { %v632_v23 = vsub.f32 1.0, %v631_v22 }
 0x125   : > { %v633_v24 = vmul.f32 %v2299_v21, %v632_v23 }
 0x127   : > { %v634_v25 = vadd.f32 %v2299_v21, %v633_v24 }
 0x129   : > { %v638_v28 = vsel %vm637_vm3, %v2299_v21, %v634_v25  ;;  %v561_v21 = vld.sshfl [vmem:[#allocation1 + $0x10] sm:$0xff pattern:$0x75316420] }
 0x12a   : > { %v643_v31 = vsel %vm640_vm4, %v642_v29, %v638_v28  ;;  %2168 = vmatmul.msk.f32.gmra.mxu0 %vm564_vm0, %v561_v21 }
 0x12b   : > { %v646_v34 = vmul.f32 0.0, %v643_v31 }
 0x188   : > { %v649_v30 = vpop.permute.xlu0 %648 }
 0x189   : > { %v651_v32 = vmul.f32 %v649_v30, %v643_v31 }
 0x18b   : > { %653 = vrot.lane.b32.xlu0 %v651_v32, %s2653_s30 }
 0x1a7   : > { %v593_v25 = vpop.f32.mrf.mxu0 }
 0x1a8   : > { %v594_v26 = vadd.f32 %v2966_v12, %v593_v25 }
 0x1fd   : > { %v654_v35 = vpop.permute.xlu0 %653 }
 0x1fe   : > { %v656_v36 = vadd.f32 %v654_v35, %v646_v34 }
 0x200   : > { %2300 = vtanh.f32 %v656_v36 }
 0x206   : > { %v2301_v37 = vpop.eup %2300 }
 0x207   : > { %659 = vrot.lane.b32.xlu1 %v2301_v37, %s2652_s5 }
 0x20f   : > { %666 = vperm.xlu1 %2289, %v664_v39  }
 0x279   : > { %v660_v40 = vpop.permute.xlu1 %659 }
 0x27a   : > { %v662_v41 = vmul.f32 %v660_v40, %v643_v31 }
 0x281   : > { %v2982_v42 = vpop.permute.xlu1 %666 }
 0x282   : > { %vm668_vm6 = vcmp.eq.s32.totalorder %v2982_v42, 1 }
 0x283   : > { %v669_v43 = vsel %vm668_vm6, %v662_v41, 0.0  ;;  %v670_v51 = vsel %vm668_vm6, %v656_v36, 0.0 }
 0x284   : > { %672 = vrot.lane.b32.xlu2 %v669_v43, %s2653_s30  ;;  %v724_v3 = vrot.slane %v670_v51, 4 }
 0x2de   : > { %v2988_v44 = vpop.permute.xlu2 %672 }
 0x2df   : > { %676 = vst.msk [vmem:[#allocation2] sm:$0xf] %vm675_vm7, %v2988_v44  ;;  %2172 = vmatmul.msk.f32.vlgmr.msra.gmra.mxu2 %vm564_vm0, %v2988_v44 }
 0x2e0   : > { %1204 = vmatpush.msra.mxu2 %v2917_v2 }
 0x2e2   : > { %1205 = vmatpush.msra.mxu2 %v2920_v4 }
 0x2e4   : > { %1206 = vmatpush.msra.mxu2 %v2922_v5 }
 0x2e6   : > { %v1270_v45 = vld [vmem:[#allocation2] sm:$0xf]  ;;  %1207 = vmatpush.msra.mxu2 %v2933_v9 }
 0x2e7   : > { %1298 = vst [vmem:[#allocation1] ss:$2 sm:$0xff] %v1270_v45 }
 0x362   : > { %v696_v46 = vpop.f32.mrf.mxu2 }
 0x363   : > { %v700_v47 = vrot.slane %v696_v46, 4 }
 0x365   : > { %v702_v48 = vadd.f32 %v700_v47, %v591_v15 }
 0x367   : > { %2302 = vtanh.f32 %v702_v48  ;;  %v2173_v52 = vmul.f32 -1.442695, %v702_v48 }
 0x369   : > { %2304 = vpow2.f32 %v2173_v52 }
 0x36d   : > { %v2303_v49 = vpop.eup %2302 }
 0x36e   : > { %728 = vrot.lane.b32.xlu2 %v2303_v49, %s2652_s5 }
 0x36f   : > { %v2305_v53 = vpop.eup %2304 }
 0x370   : > { %v706_v54 = vadd.f32 1.0, %v2305_v53 }
 0x372   : > { %2306 = vrcp.f32 %v706_v54  ;;  %v718_v60 = vand.u32 2147483648, %v706_v54  ;;  %vm712_vm10 = vweird.f32 %v706_v54  ;;  %v716_v61 = vand.u32 2147483647, %v706_v54 }
 0x374   : > { %v719_v63 = vor.u32 1.1754944e-38, %v718_v60  ;;  %vm717_vm12 = vcmp.eq.f32.partialorder %v716_v61, 8.507059e+37 }
 0x376   : > { %746 = vperm.xlu2 %2290, %v744_v50  }
 0x378   : > { %v2307_v55 = vpop.eup %2306 }
 0x379   : > { %v708_v56 = vmul.f32 %v2307_v55, %v706_v54  ;;  %vm713_vm9 = vweird.f32 %v2307_v55 }
 0x37a   : > { %vm714_vm11 = vmor %vm712_vm10, %vm713_vm9 }
 0x37b   : > { %v709_v57 = vsub.f32 1.0, %v708_v56 }
 0x37d   : > { %v710_v58 = vmul.f32 %v2307_v55, %v709_v57 }
 0x37e   : > { %760 = vrot.lane.b32.xlu2 %v670_v51, %s2655_s8 }
 0x37f   : > { %v711_v59 = vadd.f32 %v2307_v55, %v710_v58 }
 0x381   : > { %v715_v62 = vsel %vm714_vm11, %v2307_v55, %v711_v59 }
 0x382   : > { %v720_v1 = vsel %vm717_vm12, %v719_v63, %v715_v62 }
 0x383   : > { %v726_v4 = vmul.f32 %v724_v3, %v720_v1 }
 0x3c8   : > { %v729_v0 = vpop.permute.xlu2 %728 }
 0x3c9   : > { %v731_v2 = vmul.f32 %v729_v0, %v720_v1  ;;  %v915_v0 = vsel %vm914_vm5, 1, %v2654_v33 }
 0x3cb   : > { %733 = vrot.lane.b32.xlu0 %v731_v2, %s2653_s30 }
 0x3d0   : > { %v3007_v9 = vpop.permute.xlu2 %746 }
 0x3d1   : > { %vm748_vm13 = vcmp.eq.s32.totalorder %v3007_v9, 1 }
 0x3d8   : > { %v761_v15 = vpop.permute.xlu2 %760 }
 0x43d   : > { %v734_v5 = vpop.permute.xlu0 %733 }
 0x43e   : > { %v736_v6 = vadd.f32 %v734_v5, %v726_v4 }
 0x440   : > { %2308 = vtanh.f32 %v736_v6  ;;  %v756_v8 = vrot.slane %v736_v6, 4 }
 0x446   : > { %v2309_v7 = vpop.eup %2308 }
 0x447   : > { %739 = vrot.lane.b32.xlu1 %v2309_v7, %s2652_s5 }
 0x44f   : > { %757 = vrot.lane.b32.xlu1 %v756_v8, %s2655_s8 }
 0x4b9   : > { %v740_v11 = vpop.permute.xlu1 %739 }
 0x4ba   : > { %v742_v13 = vmul.f32 %v740_v11, %v720_v1 }
 0x4bc   : > { %v750_v14 = vrot.slane %v742_v13, 4 }
 0x4be   : > { %751 = vrot.lane.b32.xlu0 %v750_v14, %s2653_s30 }
 0x4c1   : > { %v758_v16 = vpop.permute.xlu1 %757 }
 0x4c2   : > { %v763_v17 = vsel %vm748_vm13, %v758_v16, %v761_v15 }
 0x4c3   : > { %811 = vrot.lane.b32.xlu1 %v763_v17, %s2653_s30 }
 0x4cb   : > { %834 = vperm.xlu1 %2289, %v832_v18  }
 0x530   : > { %v752_v22 = vpop.permute.xlu0 %751 }
 0x531   : > { %v754_v23 = vsel %vm748_vm13, %v752_v22, %v2988_v44 }
 0x532   : > { %765 = vst.msk [vmem:[#allocation2 + $0x4] sm:$0xf] %vm675_vm7, %v754_v23  ;;  %2174 = vmatmul.msk.f32.vlgmr.msra.gmra.mxu3 %vm564_vm0, %v754_v23 }
 0x535   : > { %v812_v48 = vpop.permute.xlu1 %811 }
 0x539   : > { %v1271_v24 = vld [vmem:[#allocation2 + $0x4] sm:$0xf] }
 0x53a   : > { %1300 = vst [vmem:[#allocation1 + $0x1] ss:$2 sm:$0xff] %v1271_v24 }
 0x53d   : > { %v3029_v53 = vpop.permute.xlu1 %834 }
 0x53e   : > { %vm836_vm4 = vcmp.eq.s32.totalorder %v3029_v53, 1 }
 0x5b5   : > { %v786_v27 = vpop.f32.mrf.mxu3 }
 0x5b6   : > { %v789_v28 = vadd.f32 %v786_v27, %v594_v26 }
 0x5b8   : > { %2310 = vtanh.f32 %v789_v28  ;;  %v2175_v30 = vmul.f32 -1.442695, %v789_v28 }
 0x5ba   : > { %2312 = vpow2.f32 %v2175_v30 }
 0x5be   : > { %v2311_v29 = vpop.eup %2310 }
 0x5bf   : > { %816 = vrot.lane.b32.xlu0 %v2311_v29, %s2652_s5 }
 0x5c0   : > { %v2313_v31 = vpop.eup %2312 }
 0x5c1   : > { %v793_v32 = vadd.f32 1.0, %v2313_v31 }
 0x5c3   : > { %2314 = vrcp.f32 %v793_v32  ;;  %v805_v40 = vand.u32 2147483648, %v793_v32  ;;  %vm799_vm1 = vweird.f32 %v793_v32  ;;  %v803_v41 = vand.u32 2147483647, %v793_v32 }
 0x5c5   : > { %v806_v44 = vor.u32 1.1754944e-38, %v805_v40  ;;  %vm804_vm3 = vcmp.eq.f32.partialorder %v803_v41, 8.507059e+37 }
 0x5c9   : > { %v2315_v34 = vpop.eup %2314 }
 0x5ca   : > { %v795_v35 = vmul.f32 %v2315_v34, %v793_v32  ;;  %vm800_vm15 = vweird.f32 %v2315_v34 }
 0x5cb   : > { %vm801_vm2 = vmor %vm799_vm1, %vm800_vm15 }
 0x5cc   : > { %v796_v36 = vsub.f32 1.0, %v795_v35  ;;  %v522_v35 = vld [vmem:[%s2893_s14 + $0x14] sm:$0xf] }
 0x5cd   : > { %555 = vst [vmem:[#allocation1 + $0x21] ss:$2 sm:$0xff] %v522_v35 }
 0x5ce   : > { %v797_v37 = vmul.f32 %v2315_v34, %v796_v36 }
 0x5d0   : > { %v798_v39 = vadd.f32 %v2315_v34, %v797_v37 }
 0x5d2   : > { %v802_v43 = vsel %vm801_vm2, %v2315_v34, %v798_v39  ;;  %v521_v34 = vld [vmem:[%s2893_s14 + $0x10] sm:$0xf] }
 0x5d3   : > { %v807_v46 = vsel %vm804_vm3, %v806_v44, %v802_v43  ;;  %553 = vst [vmem:[#allocation1 + $0x20] ss:$2 sm:$0xff] %v521_v34 }
 0x5d4   : > { %v814_v49 = vmul.f32 %v812_v48, %v807_v46 }
 0x5da   : > { %v562_v36 = vld.sshfl [vmem:[#allocation1 + $0x20] sm:$0xff pattern:$0x75316420] }
 0x5db   : > { %2169 = vmatmul.msk.f32.gmra.mxu0 %vm564_vm0, %v562_v36 }
 0x631   : > { %v817_v45 = vpop.permute.xlu0 %816 }
 0x632   : > { %v819_v47 = vmul.f32 %v817_v45, %v807_v46 }
 0x634   : > { %821 = vrot.lane.b32.xlu2 %v819_v47, %s2653_s30 }
 0x63c   : > { %837 = vrot.lane.b32.xlu2 %v754_v23, %s2655_s8 }
 0x658   : > { %v596_v41 = vpop.f32.mrf.mxu0 }
 0x659   : > { %v3066_v43 = vadd.f32 %v2966_v12, %v596_v41 }
 0x68e   : > { %v822_v50 = vpop.permute.xlu2 %821 }
 0x68f   : > { %v824_v51 = vadd.f32 %v822_v50, %v814_v49  ;;  %v1003_v50 = vsel %vm1002_vm14, 1, %v2654_v33 }
 0x691   : > { %2316 = vtanh.f32 %v824_v51  ;;  %v841_v1 = vsel %vm836_vm4, %v824_v51, %v812_v48 }
 0x692   : > { %v895_v20 = vrot.slane %v841_v1, 4 }
 0x696   : > { %v838_v56 = vpop.permute.xlu2 %837 }
 0x697   : > { %v2317_v52 = vpop.eup %2316 }
 0x698   : > { %827 = vrot.lane.b32.xlu0 %v2317_v52, %s2652_s5 }
 0x70a   : > { %v828_v54 = vpop.permute.xlu0 %827 }
 0x70b   : > { %v830_v55 = vmul.f32 %v828_v54, %v807_v46 }
 0x70d   : > { %v840_v57 = vsel %vm836_vm4, %v830_v55, %v838_v56 }
 0x70e   : > { %843 = vrot.lane.b32.xlu0 %v840_v57, %s2653_s30 }
 0x780   : > { %v3035_v58 = vpop.permute.xlu0 %843 }
 0x781   : > { %847 = vst.msk [vmem:[#allocation2 + $0x8] sm:$0xf] %vm675_vm7, %v3035_v58  ;;  %2176 = vmatmul.msk.f32.vlgmr.msrb.gmra.mxu1 %vm564_vm0, %v3035_v58 }
 0x788   : > { %v1272_v59 = vld [vmem:[#allocation2 + $0x8] sm:$0xf] }
 0x789   : > { %1302 = vst [vmem:[#allocation1 + $0x10] ss:$2 sm:$0xff] %v1272_v59 }
 0x7fe   : > { %v867_v60 = vpop.f32.mrf.mxu1 }
 0x7ff   : > { %v871_v61 = vrot.slane %v867_v60, 4 }
 0x801   : > { %v873_v62 = vadd.f32 %v871_v61, %v594_v26 }
 0x803   : > { %2318 = vtanh.f32 %v873_v62  ;;  %v2177_v2 = vmul.f32 -1.442695, %v873_v62 }
 0x805   : > { %2320 = vpow2.f32 %v2177_v2 }
 0x809   : > { %v2319_v63 = vpop.eup %2318 }
 0x80a   : > { %899 = vrot.lane.b32.xlu1 %v2319_v63, %s2652_s5 }
 0x80b   : > { %v2321_v3 = vpop.eup %2320 }
 0x80c   : > { %v877_v4 = vadd.f32 1.0, %v2321_v3 }
 0x80e   : > { %2322 = vrcp.f32 %v877_v4  ;;  %v889_v13 = vand.u32 2147483648, %v877_v4  ;;  %vm883_vm9 = vweird.f32 %v877_v4  ;;  %v887_v14 = vand.u32 2147483647, %v877_v4 }
 0x810   : > { %v890_v16 = vor.u32 1.1754944e-38, %v889_v13  ;;  %vm888_vm11 = vcmp.eq.f32.partialorder %v887_v14, 8.507059e+37  ;;  %v1281_v13 = vld [vmem:[%s2907_s27 + $0x18] sm:$0xff]  ;;  %v1280_v14 = vld [vmem:[%s2907_s27 + $0x10] sm:$0xff] }
 0x811   : > { %1337 = vmatpush.msra.mxu3 %v1281_v13 }
 0x812   : > { %917 = vperm.xlu1 %2289, %v915_v0  }
 0x813   : > { %1338 = vmatpush.msra.mxu3 %v1280_v14 }
 0x814   : > { %v2323_v5 = vpop.eup %2322 }
 0x815   : > { %v879_v6 = vmul.f32 %v2323_v5, %v877_v4  ;;  %vm884_vm8 = vweird.f32 %v2323_v5 }
 0x816   : > { %vm885_vm10 = vmor %vm883_vm9, %vm884_vm8  ;;  %vm1085_vm8 = vcmp.gt.s32.totalorder %v2977_v38, 5 }
 0x817   : > { %v880_v7 = vsub.f32 1.0, %v879_v6 }
 0x819   : > { %v881_v8 = vmul.f32 %v2323_v5, %v880_v7 }
 0x81a   : > { %931 = vrot.lane.b32.xlu1 %v841_v1, %s2655_s8 }
 0x81b   : > { %v882_v11 = vadd.f32 %v2323_v5, %v881_v8 }
 0x81d   : > { %v886_v15 = vsel %vm885_vm10, %v2323_v5, %v882_v11 }
 0x81e   : > { %v891_v18 = vsel %vm888_vm11, %v890_v16, %v886_v15  ;;  %v1279_v15 = vld [vmem:[%s2907_s27 + $0x8] sm:$0xff]  ;;  %v1278_v16 = vld [vmem:[%s2907_s27] sm:$0xff] }
 0x81f   : > { %v897_v21 = vmul.f32 %v895_v20, %v891_v18  ;;  %1339 = vmatpush.msra.mxu3 %v1279_v15 }
 0x821   : > { %1340 = vmatpush.msra.mxu3 %v1278_v16 }
 0x87c   : > { %v900_v17 = vpop.permute.xlu1 %899 }
 0x87d   : > { %v902_v19 = vmul.f32 %v900_v17, %v891_v18 }
 0x87f   : > { %904 = vrot.lane.b32.xlu2 %v902_v19, %s2653_s30  ;;  %v1313_v19 = vld.sshfl [vmem:[#allocation1] sm:$0xff pattern:$0x75316420] }
 0x884   : > { %v3050_v26 = vpop.permute.xlu1 %917 }
 0x885   : > { %vm919_vm12 = vcmp.eq.s32.totalorder %v3050_v26, 1 }
 0x88c   : > { %v932_v30 = vpop.permute.xlu1 %931 }
 0x8d9   : > { %v905_v22 = vpop.permute.xlu2 %904 }
 0x8da   : > { %v907_v23 = vadd.f32 %v905_v22, %v897_v21 }
 0x8dc   : > { %2324 = vtanh.f32 %v907_v23  ;;  %v927_v25 = vrot.slane %v907_v23, 4 }
 0x8e2   : > { %v2325_v24 = vpop.eup %2324 }
 0x8e3   : > { %910 = vrot.lane.b32.xlu0 %v2325_v24, %s2652_s5 }
 0x8eb   : > { %928 = vrot.lane.b32.xlu0 %v927_v25, %s2655_s8  ;;  %v1086_v25 = vsel %vm1085_vm8, 1, %v2654_v33 }
 0x955   : > { %v911_v27 = vpop.permute.xlu0 %910 }
 0x956   : > { %v913_v28 = vmul.f32 %v911_v27, %v891_v18 }
 0x958   : > { %v921_v29 = vrot.slane %v913_v28, 4 }
 0x95a   : > { %922 = vrot.lane.b32.xlu2 %v921_v29, %s2653_s30 }
 0x95d   : > { %v929_v31 = vpop.permute.xlu0 %928 }
 0x95e   : > { %v934_v32 = vsel %vm919_vm12, %v929_v31, %v932_v30 }
 0x95f   : > { %982 = vrot.lane.b32.xlu0 %v934_v32, %s2653_s30 }
 0x967   : > { %1005 = vperm.xlu0 %2291, %v1003_v50  }
 0x9b4   : > { %v923_v37 = vpop.permute.xlu2 %922 }
 0x9b5   : > { %v925_v39 = vsel %vm919_vm12, %v923_v37, %v3035_v58 }
 0x9b6   : > { %936 = vst.msk [vmem:[#allocation2 + $0xc] sm:$0xf] %vm675_vm7, %v925_v39  ;;  %2178 = vmatmul.msk.f32.vlgmr.msrb.gmra.mxu2 %vm564_vm0, %v925_v39 }
 0x9bd   : > { %v1273_v40 = vld [vmem:[#allocation2 + $0xc] sm:$0xf] }
 0x9be   : > { %1304 = vst [vmem:[#allocation1 + $0x11] ss:$2 sm:$0xff] %v1273_v40 }
 0x9c5   : > { %v1314_v20 = vld.sshfl [vmem:[#allocation1 + $0x10] sm:$0xff pattern:$0x75316420] }
 0x9d1   : > { %v983_v0 = vpop.permute.xlu0 %982 }
 0x9d9   : > { %v3075_v5 = vpop.permute.xlu0 %1005 }
 0x9da   : > { %vm1007_vm5 = vcmp.eq.s32.totalorder %v3075_v5, 1 }
 0xa39   : > { %v957_v44 = vpop.f32.mrf.mxu2 }
 0xa3a   : > { %v960_v45 = vadd.f32 %v957_v44, %v3066_v43 }
 0xa3c   : > { %2326 = vtanh.f32 %v960_v45  ;;  %v2179_v47 = vmul.f32 -1.442695, %v960_v45 }
 0xa3e   : > { %2328 = vpow2.f32 %v2179_v47 }
 0xa42   : > { %v2327_v46 = vpop.eup %2326 }
 0xa43   : > { %987 = vrot.lane.b32.xlu2 %v2327_v46, %s2652_s5 }
 0xa44   : > { %v2329_v48 = vpop.eup %2328 }
 0xa45   : > { %v964_v49 = vadd.f32 1.0, %v2329_v48 }
 0xa47   : > { %2330 = vrcp.f32 %v964_v49  ;;  %v976_v57 = vand.u32 2147483648, %v964_v49  ;;  %vm970_vm1 = vweird.f32 %v964_v49  ;;  %v974_v58 = vand.u32 2147483647, %v964_v49 }
 0xa49   : > { %v977_v60 = vor.u32 1.1754944e-38, %v976_v57  ;;  %vm975_vm3 = vcmp.eq.f32.partialorder %v974_v58, 8.507059e+37 }
 0xa4d   : > { %v2331_v51 = vpop.eup %2330 }
 0xa4e   : > { %v966_v52 = vmul.f32 %v2331_v51, %v964_v49  ;;  %vm971_vm15 = vweird.f32 %v2331_v51 }
 0xa4f   : > { %vm972_vm2 = vmor %vm970_vm1, %vm971_vm15 }
 0xa50   : > { %v967_v54 = vsub.f32 1.0, %v966_v52  ;;  %v523_v52 = vld [vmem:[%s2893_s14 + $0x18] sm:$0xf] }
 0xa51   : > { %557 = vst [vmem:[#allocation1 + $0x30] ss:$2 sm:$0xff] %v523_v52 }
 0xa52   : > { %v968_v55 = vmul.f32 %v2331_v51, %v967_v54  ;;  %v524_v54 = vld [vmem:[%s2893_s14 + $0x1c] sm:$0xf]  ;;  %s450_s14 = scalar_lea.vmem [#allocation11], %s2889_s19 }
 0xa53   : > { %559 = vst [vmem:[#allocation1 + $0x31] ss:$2 sm:$0xff] %v524_v54 }
 0xa54   : > { %v969_v56 = vadd.f32 %v2331_v51, %v968_v55 }
 0xa56   : > { %v973_v59 = vsel %vm972_vm2, %v2331_v51, %v969_v56 }
 0xa57   : > { %v978_v62 = vsel %vm975_vm3, %v977_v60, %v973_v59 }
 0xa58   : > { %v985_v1 = vmul.f32 %v983_v0, %v978_v62 }
 0xa5a   : > { %v563_v55 = vld.sshfl [vmem:[#allocation1 + $0x30] sm:$0xff pattern:$0x75316420] }
 0xa5b   : > { %2170 = vmatmul.msk.f32.gmra.mxu0 %vm564_vm0, %v563_v55 }
 0xa9d   : > { %v988_v61 = vpop.permute.xlu2 %987 }
 0xa9e   : > { %v990_v63 = vmul.f32 %v988_v61, %v978_v62 }
 0xaa0   : > { %992 = vrot.lane.b32.xlu1 %v990_v63, %s2653_s30  ;;  %v3118_v63 = vld [vmem:[%s450_s14 + $0x18] sm:$0xff] }
 0xaa1   : > { %1366 = vmatpush.msrb.mxu1 %v3118_v63  ;;  %1431 = vmatpush.msrb.mxu2 %v3118_v63 }
 0xaa2   : > { %1514 = vmatpush.msrb.mxu0 %v3118_v63 }
 0xaa8   : > { %1008 = vrot.lane.b32.xlu1 %v925_v39, %s2655_s8 }
 0xb12   : > { %v993_v2 = vpop.permute.xlu1 %992 }
 0xb13   : > { %v995_v3 = vadd.f32 %v993_v2, %v985_v1  ;;  %v3127_v1 = vld [vmem:[%s450_s14 + $0x8] sm:$0xff]  ;;  %v3132_v2 = vld [vmem:[%s450_s14] sm:$0xff] }
 0xb15   : > { %2332 = vtanh.f32 %v995_v3  ;;  %v1012_v27 = vsel %vm1007_vm5, %v995_v3, %v983_v0  ;;  %v3122_v0 = vld [vmem:[%s450_s14 + $0x10] sm:$0xff] }
 0xb16   : > { %v1066_v46 = vrot.slane %v1012_v27, 4  ;;  %1367 = vmatpush.msrb.mxu1 %v3122_v0  ;;  %1432 = vmatpush.msrb.mxu2 %v3122_v0 }
 0xb17   : > { %1515 = vmatpush.msrb.mxu0 %v3122_v0 }
 0xb18   : > { %1368 = vmatpush.msrb.mxu1 %v3127_v1  ;;  %1433 = vmatpush.msrb.mxu2 %v3127_v1 }
 0xb19   : > { %1516 = vmatpush.msrb.mxu0 %v3127_v1 }
 0xb1a   : > { %v1009_v8 = vpop.permute.xlu1 %1008  ;;  %1369 = vmatpush.msrb.mxu1 %v3132_v2  ;;  %1434 = vmatpush.msrb.mxu2 %v3132_v2 }
 0xb1b   : > { %v2333_v4 = vpop.eup %2332  ;;  %1517 = vmatpush.msrb.mxu0 %v3132_v2 }
 0xb1c   : > { %998 = vrot.lane.b32.xlu2 %v2333_v4, %s2652_s5 }
 0xb1d   : > { %1741 = vmatpush.msra.mxu0 %v3118_v63 }
 0xb1f   : > { %1742 = vmatpush.msra.mxu0 %v3122_v0 }
 0xb21   : > { %1743 = vmatpush.msra.mxu0 %v3127_v1 }
 0xb23   : > { %1744 = vmatpush.msra.mxu0 %v3132_v2 }
 0xb76   : > { %v999_v6 = vpop.permute.xlu2 %998 }
 0xb77   : > { %v1001_v7 = vmul.f32 %v999_v6, %v978_v62 }
 0xb79   : > { %v1011_v11 = vsel %vm1007_vm5, %v1001_v7, %v1009_v8  ;;  %v599_v8 = vpop.f32.mrf.mxu0 }
 0xb7a   : > { %1014 = vrot.lane.b32.xlu2 %v1011_v11, %s2653_s30  ;;  %v3162_v11 = vadd.f32 %v2966_v12, %v599_v8 }
 0xbd4   : > { %v3085_v17 = vpop.permute.xlu2 %1014 }
 0xbd5   : > { %1018 = vst.msk [vmem:[#allocation2 + $0x10] sm:$0xf] %vm675_vm7, %v3085_v17  ;;  %2180 = vmatmul.msk.f32.vlgmr.msrb.gmra.mxu3 %vm564_vm0, %v3085_v17 }
 0xbdc   : > { %v1274_v18 = vld [vmem:[#allocation2 + $0x10] sm:$0xf] }
 0xbdd   : > { %1306 = vst [vmem:[#allocation1 + $0x20] ss:$2 sm:$0xff] %v1274_v18  ;;  %2186 = vmatmul.msk.f32.vlgmr.msra.gmra.mxu3 %vm564_vm0, %v1313_v19 }
 0xbe5   : > { %2187 = vmatmul.msk.f32.gmra.mxu3 %vm564_vm0, %v1314_v20 }
 0xc58   : > { %v1038_v21 = vpop.f32.mrf.mxu3 }
 0xc59   : > { %v1042_v22 = vrot.slane %v1038_v21, 4 }
 0xc5b   : > { %v1044_v23 = vadd.f32 %v1042_v22, %v3066_v43 }
 0xc5d   : > { %2334 = vtanh.f32 %v1044_v23  ;;  %v2181_v28 = vmul.f32 -1.442695, %v1044_v23 }
 0xc5f   : > { %2336 = vpow2.f32 %v2181_v28 }
 0xc60   : > { %v1342_v15 = vpop.f32.mrf.mxu3 }
 0xc63   : > { %v2335_v24 = vpop.eup %2334 }
 0xc64   : > { %1070 = vrot.lane.b32.xlu1 %v2335_v24, %s2652_s5 }
 0xc65   : > { %v2337_v29 = vpop.eup %2336 }
 0xc66   : > { %v1048_v30 = vadd.f32 1.0, %v2337_v29 }
 0xc68   : > { %2338 = vrcp.f32 %v1048_v30  ;;  %v1060_v37 = vand.u32 2147483648, %v1048_v30  ;;  %vm1054_vm10 = vweird.f32 %v1048_v30  ;;  %v1058_v39 = vand.u32 2147483647, %v1048_v30 }
 0xc6a   : > { %v1061_v41 = vor.u32 1.1754944e-38, %v1060_v37  ;;  %vm1059_vm14 = vcmp.eq.f32.partialorder %v1058_v39, 8.507059e+37 }
 0xc6c   : > { %1088 = vperm.xlu1 %2289, %v1086_v25  }
 0xc6e   : > { %v2339_v31 = vpop.eup %2338 }
 0xc6f   : > { %v1050_v32 = vmul.f32 %v2339_v31, %v1048_v30  ;;  %vm1055_vm9 = vweird.f32 %v2339_v31 }
 0xc70   : > { %vm1056_vm11 = vmor %vm1054_vm10, %vm1055_vm9  ;;  %vm1173_vm9 = vcmp.gt.s32.totalorder %v2977_v38, 6 }
 0xc71   : > { %v1051_v34 = vsub.f32 1.0, %v1050_v32 }
 0xc73   : > { %v1052_v35 = vmul.f32 %v2339_v31, %v1051_v34 }
 0xc74   : > { %1102 = vrot.lane.b32.xlu1 %v1012_v27, %s2655_s8 }
 0xc75   : > { %v1053_v36 = vadd.f32 %v2339_v31, %v1052_v35 }
 0xc77   : > { %v1057_v40 = vsel %vm1056_vm11, %v2339_v31, %v1053_v36 }
 0xc78   : > { %v1062_v44 = vsel %vm1059_vm14, %v1061_v41, %v1057_v40  ;;  %v1174_v41 = vsel %vm1173_vm9, 1, %v2654_v33 }
 0xc79   : > { %v1068_v47 = vmul.f32 %v1066_v46, %v1062_v44 }
 0xcd6   : > { %v1071_v43 = vpop.permute.xlu1 %1070 }
 0xcd7   : > { %v1073_v45 = vmul.f32 %v1071_v43, %v1062_v44 }
 0xcd9   : > { %1075 = vrot.lane.b32.xlu2 %v1073_v45, %s2653_s30 }
 0xcde   : > { %v3110_v56 = vpop.permute.xlu1 %1088 }
 0xcdf   : > { %vm1090_vm15 = vcmp.eq.s32.totalorder %v3110_v56, 1 }
 0xce6   : > { %v1103_v60 = vpop.permute.xlu1 %1102 }
 0xd33   : > { %v1076_v48 = vpop.permute.xlu2 %1075 }
 0xd34   : > { %v1078_v49 = vadd.f32 %v1076_v48, %v1068_v47 }
 0xd36   : > { %2340 = vtanh.f32 %v1078_v49  ;;  %v1098_v51 = vrot.slane %v1078_v49, 4 }
 0xd3c   : > { %v2341_v50 = vpop.eup %2340 }
 0xd3d   : > { %1081 = vrot.lane.b32.xlu0 %v2341_v50, %s2652_s5 }
 0xd45   : > { %1099 = vrot.lane.b32.xlu0 %v1098_v51, %s2655_s8 }
 0xdaf   : > { %v1082_v57 = vpop.permute.xlu0 %1081 }
 0xdb0   : > { %v1084_v58 = vmul.f32 %v1082_v57, %v1062_v44 }
 0xdb2   : > { %v1092_v59 = vrot.slane %v1084_v58, 4 }
 0xdb4   : > { %1093 = vrot.lane.b32.xlu2 %v1092_v59, %s2653_s30 }
 0xdb7   : > { %v1100_v61 = vpop.permute.xlu0 %1099 }
 0xdb8   : > { %v1105_v62 = vsel %vm1090_vm15, %v1100_v61, %v1103_v60 }
 0xdb9   : > { %1153 = vrot.lane.b32.xlu1 %v1105_v62, %s2653_s30 }
 0xe0e   : > { %v1094_v3 = vpop.permute.xlu2 %1093 }
 0xe0f   : > { %v3145_v4 = vsel %vm1090_vm15, %v1094_v3, %v3085_v17 }
 0xe10   : > { %1107 = vst.msk [vmem:[#allocation2 + $0x14] sm:$0xf] %vm675_vm7, %v3145_v4  ;;  %2182 = vmatmul.msk.f32.vlgmr.msra.gmra.mxu1 %vm564_vm0, %v3145_v4 }
 0xe11   : > { %1586 = vmatpush.msra.mxu1 %v3118_v63 }
 0xe13   : > { %1587 = vmatpush.msra.mxu1 %v3122_v0 }
 0xe15   : > { %1588 = vmatpush.msra.mxu1 %v3127_v1 }
 0xe17   : > { %v1275_v6 = vld [vmem:[#allocation2 + $0x14] sm:$0xf]  ;;  %1589 = vmatpush.msra.mxu1 %v3132_v2 }
 0xe18   : > { %1308 = vst [vmem:[#allocation1 + $0x21] ss:$2 sm:$0xff] %v1275_v6  ;;  %1370 = vmatmul.f32.vlgmr.msrb.gmra.mxu1 %v2651_v10  ;;  %v3170_v10 = vld [vmem:[%s515_s20] ss:$0 sm:$0xff] }
 0xe19   : > { %1824 = vmatpush.msrb.mxu1 %v3118_v63  ;;  %v3173_v16 = vadd.f32 %v3170_v10, %v1342_v15 }
 0xe1b   : > { %1825 = vmatpush.msrb.mxu1 %v3122_v0 }
 0xe1d   : > { %1826 = vmatpush.msrb.mxu1 %v3127_v1 }
 0xe1f   : > { %v1315_v7 = vld.sshfl [vmem:[#allocation1 + $0x20] sm:$0xff pattern:$0x75316420]  ;;  %1827 = vmatpush.msrb.mxu1 %v3132_v2 }
 0xe20   : > { %2188 = vmatmul.msk.f32.gmra.mxu3 %vm564_vm0, %v1315_v7 }
 0xe2b   : > { %v3184_v38 = vpop.permute.xlu1 %1153 }
 0xe8d   : > { %v1128_v13 = vpop.f32.mrf.mxu1 }
 0xe8e   : > { %v1131_v14 = vadd.f32 %v1128_v13, %v3162_v11 }
 0xe90   : > { %2342 = vtanh.f32 %v1131_v14  ;;  %v2183_v20 = vmul.f32 -1.442695, %v1131_v14 }
 0xe95   : > { %v1371_v17 = vpop.f32.mrf.mxu1 }
 0xe96   : > { %v2343_v18 = vpop.eup %2342  ;;  %v1374_v19 = vadd.f32 %v1371_v17, %v3173_v16 }
 0xe97   : > { %1158 = vrot.lane.b32.xlu2 %v2343_v18, %s2652_s5 }
 0xe98   : > { %2344 = vtanh.f32 %v1374_v19  ;;  %v2190_v27 = vmul.f32 -1.442695, %v1374_v19 }
 0xe99   : > { %2346 = vpow2.f32 %v2183_v20 }
 0xe9e   : > { %v2345_v12 = vpop.eup %2344 }
 0xe9f   : > { %1397 = vrot.lane.b32.xlu0 %v2345_v12, %s2652_s5  ;;  %v2347_v21 = vpop.eup %2346 }
 0xea0   : > { %v1135_v22 = vadd.f32 1.0, %v2347_v21 }
 0xea2   : > { %2348 = vrcp.f32 %v1135_v22  ;;  %v1147_v30 = vand.u32 2147483648, %v1135_v22  ;;  %vm1141_vm2 = vweird.f32 %v1135_v22  ;;  %v1145_v31 = vand.u32 2147483647, %v1135_v22 }
 0xea3   : > { %2350 = vpow2.f32 %v2190_v27 }
 0xea4   : > { %v1148_v35 = vor.u32 1.1754944e-38, %v1147_v30  ;;  %vm1146_vm8 = vcmp.eq.f32.partialorder %v1145_v31, 8.507059e+37 }
 0xea8   : > { %v2349_v23 = vpop.eup %2348 }
 0xea9   : > { %v1137_v24 = vmul.f32 %v2349_v23, %v1135_v22  ;;  %vm1142_vm1 = vweird.f32 %v2349_v23  ;;  %v2351_v32 = vpop.eup %2350 }
 0xeaa   : > { %vm1143_vm3 = vmor %vm1141_vm2, %vm1142_vm1  ;;  %v1378_v36 = vadd.f32 1.0, %v2351_v32 }
 0xeab   : > { %v1138_v25 = vsub.f32 1.0, %v1137_v24 }
 0xeac   : > { %2352 = vrcp.f32 %v1378_v36  ;;  %v1390_v48 = vand.u32 2147483648, %v1378_v36  ;;  %vm1384_vm11 = vweird.f32 %v1378_v36  ;;  %v1388_v49 = vand.u32 2147483647, %v1378_v36 }
 0xead   : > { %v1139_v28 = vmul.f32 %v2349_v23, %v1138_v25 }
 0xeae   : > { %v1391_v51 = vor.u32 1.1754944e-38, %v1390_v48  ;;  %vm1389_vm1 = vcmp.eq.f32.partialorder %v1388_v49, 8.507059e+37 }
 0xeaf   : > { %v1140_v29 = vadd.f32 %v2349_v23, %v1139_v28 }
 0xeb1   : > { %v1144_v34 = vsel %vm1143_vm3, %v2349_v23, %v1140_v29 }
 0xeb2   : > { %v1149_v39 = vsel %vm1146_vm8, %v1148_v35, %v1144_v34  ;;  %v2353_v43 = vpop.eup %2352 }
 0xeb3   : > { %v1380_v44 = vmul.f32 %v2353_v43, %v1378_v36  ;;  %vm1385_vm10 = vweird.f32 %v2353_v43  ;;  %v1156_v57 = vmul.f32 %v3184_v38, %v1149_v39 }
 0xeb4   : > { %vm1386_vm14 = vmor %vm1384_vm11, %vm1385_vm10 }
 0xeb5   : > { %v1381_v45 = vsub.f32 1.0, %v1380_v44 }
 0xeb7   : > { %v1382_v46 = vmul.f32 %v2353_v43, %v1381_v45 }
 0xeb9   : > { %v1383_v47 = vadd.f32 %v2353_v43, %v1382_v46 }
 0xebb   : > { %v1387_v50 = vsel %vm1386_vm14, %v2353_v43, %v1383_v47 }
 0xebc   : > { %v1392_v54 = vsel %vm1389_vm1, %v1391_v51, %v1387_v50 }
 0xebd   : > { %v1395_v61 = vmul.f32 0.0, %v1392_v54 }
 0xef1   : > { %v1159_v37 = vpop.permute.xlu2 %1158 }
 0xef2   : > { %v1161_v40 = vmul.f32 %v1159_v37, %v1149_v39 }
 0xef4   : > { %1163 = vrot.lane.b32.xlu2 %v1161_v40, %s2653_s30 }
 0xefc   : > { %1176 = vperm.xlu2 %2290, %v1174_v41  }
 0xf11   : > { %v1398_v52 = vpop.permute.xlu0 %1397 }
 0xf12   : > { %v1400_v55 = vmul.f32 %v1398_v52, %v1392_v54 }
 0xf14   : > { %1402 = vrot.lane.b32.xlu0 %v1400_v55, %s2653_s30  ;;  %v1345_v55 = vpop.f32.mrf.mxu3 }
 0xf1c   : > { %1179 = vrot.lane.b32.xlu0 %v3145_v4, %s2655_s8 }
 0xf4e   : > { %v1164_v58 = vpop.permute.xlu2 %1163 }
 0xf4f   : > { %v3187_v59 = vadd.f32 %v1164_v58, %v1156_v57  ;;  %v1346_v57 = vadd.f32 %v3170_v10, %v1345_v55 }
 0xf51   : > { %2354 = vtanh.f32 %v3187_v59 }
 0xf56   : > { %v3192_v4 = vpop.permute.xlu2 %1176 }
 0xf57   : > { %v2355_v60 = vpop.eup %2354  ;;  %vm1178_vm2 = vcmp.eq.s32.totalorder %v3192_v4, 1 }
 0xf58   : > { %1169 = vrot.lane.b32.xlu1 %v2355_v60, %s2652_s5 }
 0xf86   : > { %v1403_v62 = vpop.permute.xlu0 %1402 }
 0xf87   : > { %v1405_v3 = vadd.f32 %v1403_v62, %v1395_v61 }
 0xf89   : > { %2356 = vtanh.f32 %v1405_v3 }
 0xf8e   : > { %v1180_v13 = vpop.permute.xlu0 %1179 }
 0xf8f   : > { %v2357_v6 = vpop.eup %2356 }
 0xf90   : > { %1408 = vrot.lane.b32.xlu1 %v2357_v6, %s2652_s5 }
 0xfca   : > { %v1170_v7 = vpop.permute.xlu1 %1169 }
 0xfcb   : > { %v1172_v8 = vmul.f32 %v1170_v7, %v1149_v39  ;;  %v1413_v39 = vsel %vm668_vm6, %v1405_v3, 0.0 }
 0xfcc   : > { %v1464_v40 = vrot.slane %v1413_v39, 4 }
 0xfcd   : > { %v1182_v14 = vsel %vm1178_vm2, %v1172_v8, %v1180_v13 }
 0xfce   : > { %1185 = vrot.lane.b32.xlu2 %v1182_v14, %s2653_s30 }
0x1002   : > { %v1409_v15 = vpop.permute.xlu1 %1408 }
0x1003   : > { %v1411_v17 = vmul.f32 %v1409_v15, %v1392_v54 }
0x1005   : > { %v1412_v18 = vsel %vm668_vm6, %v1411_v17, 0.0 }
0x1006   : > { %1415 = vrot.lane.b32.xlu0 %v1412_v18, %s2653_s30 }
0x1028   : > { %v3201_v19 = vpop.permute.xlu2 %1185 }
0x1029   : > { %1189 = vst.msk [vmem:[#allocation2 + $0x18] sm:$0xf] %vm675_vm7, %v3201_v19  ;;  %2184 = vmatmul.msk.f32.vlgmr.msra.gmra.mxu2 %vm564_vm0, %v3201_v19 }
0x102a   : > { %1669 = vmatpush.msra.mxu2 %v3118_v63 }
0x102c   : > { %1670 = vmatpush.msra.mxu2 %v3122_v0 }
0x102e   : > { %1671 = vmatpush.msra.mxu2 %v3127_v1 }
0x1030   : > { %v1276_v12 = vld [vmem:[#allocation2 + $0x18] sm:$0xf]  ;;  %1672 = vmatpush.msra.mxu2 %v3132_v2 }
0x1031   : > { %1310 = vst [vmem:[#allocation1 + $0x30] ss:$2 sm:$0xff] %v1276_v12 }
0x1078   : > { %v1416_v20 = vpop.permute.xlu0 %1415 }
0x1079   : > { %2191 = vmatmul.msk.f32.vlgmr.msrb.gmra.mxu2 %vm564_vm0, %v1416_v20 }
0x107a   : > { %1896 = vmatpush.msrb.mxu2 %v3118_v63 }
0x107c   : > { %1897 = vmatpush.msrb.mxu2 %v3122_v0 }
0x107e   : > { %1898 = vmatpush.msrb.mxu2 %v3127_v1 }
0x1080   : > { %1899 = vmatpush.msrb.mxu2 %v3132_v2 }
0x10ac   : > { %v3216_v21 = vpop.f32.mrf.mxu2 }
0x10fc   : > { %v1436_v22 = vpop.f32.mrf.mxu2 }
0x10fd   : > { %v1440_v23 = vrot.slane %v1436_v22, 4 }
0x10ff   : > { %v1442_v24 = vadd.f32 %v1440_v23, %v3173_v16 }
0x1101   : > { %2358 = vtanh.f32 %v1442_v24  ;;  %v2192_v27 = vmul.f32 -1.442695, %v1442_v24 }
0x1103   : > { %2360 = vpow2.f32 %v2192_v27 }
0x1107   : > { %v2359_v25 = vpop.eup %2358 }
0x1108   : > { %1468 = vrot.lane.b32.xlu1 %v2359_v25, %s2652_s5 }
0x1109   : > { %v2361_v28 = vpop.eup %2360 }
0x110a   : > { %v1446_v63 = vadd.f32 1.0, %v2361_v28 }
0x110c   : > { %2362 = vrcp.f32 %v1446_v63  ;;  %v1458_v31 = vand.u32 2147483648, %v1446_v63  ;;  %vm1452_vm8 = vweird.f32 %v1446_v63  ;;  %v1456_v32 = vand.u32 2147483647, %v1446_v63 }
0x110e   : > { %v1459_v34 = vor.u32 1.1754944e-38, %v1458_v31  ;;  %vm1457_vm10 = vcmp.eq.f32.partialorder %v1456_v32, 8.507059e+37 }
0x1112   : > { %v2363_v0 = vpop.eup %2362 }
0x1113   : > { %v1448_v29 = vmul.f32 %v2363_v0, %v1446_v63  ;;  %vm1453_vm3 = vweird.f32 %v2363_v0 }
0x1114   : > { %vm1454_vm9 = vmor %vm1452_vm8, %vm1453_vm3 }
0x1115   : > { %v1449_v1 = vsub.f32 1.0, %v1448_v29 }
0x1117   : > { %v1450_v30 = vmul.f32 %v2363_v0, %v1449_v1 }
0x1119   : > { %v1451_v2 = vadd.f32 %v2363_v0, %v1450_v30 }
0x111b   : > { %v1455_v16 = vsel %vm1454_vm9, %v2363_v0, %v1451_v2 }
0x111c   : > { %v1460_v36 = vsel %vm1457_vm10, %v1459_v34, %v1455_v16 }
0x111d   : > { %v1466_v41 = vmul.f32 %v1464_v40, %v1460_v36 }
0x117a   : > { %v1469_v35 = vpop.permute.xlu1 %1468 }
0x117b   : > { %v1471_v37 = vmul.f32 %v1469_v35, %v1460_v36 }
0x117d   : > { %1473 = vrot.lane.b32.xlu2 %v1471_v37, %s2653_s30 }
0x11d7   : > { %v1474_v43 = vpop.permute.xlu2 %1473 }
0x11d8   : > { %v1476_v44 = vadd.f32 %v1474_v43, %v1466_v41 }
0x11da   : > { %2364 = vtanh.f32 %v1476_v44  ;;  %v1491_v45 = vrot.slane %v1476_v44, 4 }
0x11dc   : > { %1492 = vrot.lane.b32.xlu2 %v1491_v45, %s2655_s8 }
0x11e0   : > { %v2365_v46 = vpop.eup %2364 }
0x11e1   : > { %1479 = vrot.lane.b32.xlu0 %v2365_v46, %s2652_s5 }
0x11e9   : > { %1495 = vrot.lane.b32.xlu0 %v1413_v39, %s2655_s8 }
0x1236   : > { %v1493_v42 = vpop.permute.xlu2 %1492 }
0x1253   : > { %v1480_v47 = vpop.permute.xlu0 %1479 }
0x1254   : > { %v1482_v48 = vmul.f32 %v1480_v47, %v1460_v36 }
0x1256   : > { %v1484_v49 = vrot.slane %v1482_v48, 4 }
0x1258   : > { %1485 = vrot.lane.b32.xlu1 %v1484_v49, %s2653_s30 }
0x125b   : > { %v1496_v50 = vpop.permute.xlu0 %1495 }
0x125c   : > { %v1498_v51 = vsel %vm748_vm13, %v1493_v42, %v1496_v50 }
0x125d   : > { %1544 = vrot.lane.b32.xlu2 %v1498_v51, %s2653_s30 }
0x12b7   : > { %v1545_v24 = vpop.permute.xlu2 %1544 }
0x12ca   : > { %v1486_v52 = vpop.permute.xlu1 %1485 }
0x12cb   : > { %v1489_v54 = vsel %vm748_vm13, %v1486_v52, %v1416_v20 }
0x12cc   : > { %2193 = vmatmul.msk.f32.vlgmr.msrb.gmra.mxu0 %vm564_vm0, %v1489_v54  ;;  %1564 = vrot.lane.b32.xlu2 %v1489_v54, %s2655_s8 }
0x1326   : > { %v1565_v1 = vpop.permute.xlu2 %1564 }
0x1349   : > { %v1519_v58 = vpop.f32.mrf.mxu0 }
0x134a   : > { %v1522_v60 = vadd.f32 %v1519_v58, %v1346_v57 }
0x134c   : > { %2366 = vtanh.f32 %v1522_v60  ;;  %v2194_v62 = vmul.f32 -1.442695, %v1522_v60 }
0x134e   : > { %2368 = vpow2.f32 %v2194_v62 }
0x1352   : > { %v2367_v61 = vpop.eup %2366 }
0x1353   : > { %1549 = vrot.lane.b32.xlu1 %v2367_v61, %s2652_s5 }
0x1354   : > { %v2369_v3 = vpop.eup %2368 }
0x1355   : > { %v1526_v6 = vadd.f32 1.0, %v2369_v3 }
0x1357   : > { %2370 = vrcp.f32 %v1526_v6  ;;  %v1538_v15 = vand.u32 2147483648, %v1526_v6  ;;  %vm1532_vm13 = vweird.f32 %v1526_v6  ;;  %v1536_v17 = vand.u32 2147483647, %v1526_v6 }
0x1359   : > { %v1539_v12 = vor.u32 1.1754944e-38, %v1538_v15  ;;  %vm1537_vm14 = vcmp.eq.f32.partialorder %v1536_v17, 8.507059e+37 }
0x135d   : > { %v2371_v9 = vpop.eup %2370 }
0x135e   : > { %v1528_v7 = vmul.f32 %v2371_v9, %v1526_v6  ;;  %vm1533_vm6 = vweird.f32 %v2371_v9 }
0x135f   : > { %vm1534_vm11 = vmor %vm1532_vm13, %vm1533_vm6 }
0x1360   : > { %v1529_v8 = vsub.f32 1.0, %v1528_v7 }
0x1362   : > { %v1530_v13 = vmul.f32 %v2371_v9, %v1529_v8 }
0x1364   : > { %v1531_v14 = vadd.f32 %v2371_v9, %v1530_v13  ;;  %v1348_v13 = vpop.f32.mrf.mxu3 }
0x1366   : > { %v1535_v18 = vsel %vm1534_vm11, %v2371_v9, %v1531_v14  ;;  %v3258_v14 = vadd.f32 %v3170_v10, %v1348_v13 }
0x1367   : > { %v1540_v22 = vsel %vm1537_vm14, %v1539_v12, %v1535_v18 }
0x1368   : > { %v1547_v25 = vmul.f32 %v1545_v24, %v1540_v22 }
0x13c5   : > { %v1550_v20 = vpop.permute.xlu1 %1549 }
0x13c6   : > { %v1552_v23 = vmul.f32 %v1550_v20, %v1540_v22 }
0x13c8   : > { %1554 = vrot.lane.b32.xlu0 %v1552_v23, %s2653_s30 }
0x143a   : > { %v1555_v27 = vpop.permute.xlu0 %1554 }
0x143b   : > { %v1557_v28 = vadd.f32 %v1555_v27, %v1547_v25 }
0x143d   : > { %2372 = vtanh.f32 %v1557_v28  ;;  %v1568_v51 = vsel %vm836_vm4, %v1557_v28, %v1545_v24 }
0x143e   : > { %v1619_v52 = vrot.slane %v1568_v51, 4 }
0x1443   : > { %v2373_v63 = vpop.eup %2372 }
0x1444   : > { %1560 = vrot.lane.b32.xlu1 %v2373_v63, %s2652_s5 }
0x14b6   : > { %v1561_v0 = vpop.permute.xlu1 %1560 }
0x14b7   : > { %v1563_v29 = vmul.f32 %v1561_v0, %v1540_v22 }
0x14b9   : > { %v1567_v30 = vsel %vm836_vm4, %v1563_v29, %v1565_v1 }
0x14ba   : > { %1570 = vrot.lane.b32.xlu0 %v1567_v30, %s2653_s30 }
0x152c   : > { %v1571_v2 = vpop.permute.xlu0 %1570 }
0x152d   : > { %2195 = vmatmul.msk.f32.vlgmr.msra.gmra.mxu1 %vm564_vm0, %v1571_v2 }
0x15aa   : > { %v1591_v31 = vpop.f32.mrf.mxu1 }
0x15ab   : > { %v1595_v32 = vrot.slane %v1591_v31, 4 }
0x15ad   : > { %v1597_v16 = vadd.f32 %v1595_v32, %v1346_v57 }
0x15af   : > { %2374 = vtanh.f32 %v1597_v16  ;;  %v2196_v35 = vmul.f32 -1.442695, %v1597_v16 }
0x15b1   : > { %2376 = vpow2.f32 %v2196_v35  ;;  %v1213_v35 = vrot.slane %v3216_v21, 4 }
0x15b5   : > { %v2375_v34 = vpop.eup %2374 }
0x15b6   : > { %1623 = vrot.lane.b32.xlu1 %v2375_v34, %s2652_s5 }
0x15b7   : > { %v2377_v36 = vpop.eup %2376 }
0x15b8   : > { %v1601_v37 = vadd.f32 1.0, %v2377_v36  ;;  %v1215_v36 = vadd.f32 %v1213_v35, %v3162_v11 }
0x15ba   : > { %2378 = vrcp.f32 %v1601_v37  ;;  %v1613_v45 = vand.u32 2147483648, %v1601_v37  ;;  %vm1607_vm3 = vweird.f32 %v1601_v37  ;;  %v1611_v46 = vand.u32 2147483647, %v1601_v37 }
0x15bc   : > { %v1614_v48 = vor.u32 1.1754944e-38, %v1613_v45  ;;  %vm1612_vm9 = vcmp.eq.f32.partialorder %v1611_v46, 8.507059e+37 }
0x15c0   : > { %v2379_v39 = vpop.eup %2378 }
0x15c1   : > { %v1603_v40 = vmul.f32 %v2379_v39, %v1601_v37  ;;  %vm1608_vm1 = vweird.f32 %v2379_v39 }
0x15c2   : > { %vm1609_vm8 = vmor %vm1607_vm3, %vm1608_vm1 }
0x15c3   : > { %v1604_v41 = vsub.f32 1.0, %v1603_v40  ;;  %v2185_v40 = vmul.f32 -1.442695, %v1215_v36 }
0x15c5   : > { %v1605_v43 = vmul.f32 %v2379_v39, %v1604_v41 }
0x15c7   : > { %v1606_v44 = vadd.f32 %v2379_v39, %v1605_v43 }
0x15c9   : > { %v1610_v47 = vsel %vm1609_vm8, %v2379_v39, %v1606_v44 }
0x15ca   : > { %v1615_v42 = vsel %vm1612_vm9, %v1614_v48, %v1610_v47 }
0x15cb   : > { %v1621_v54 = vmul.f32 %v1619_v52, %v1615_v42 }
0x1628   : > { %v1624_v49 = vpop.permute.xlu1 %1623 }
0x1629   : > { %v1626_v50 = vmul.f32 %v1624_v49, %v1615_v42 }
0x162b   : > { %1628 = vrot.lane.b32.xlu2 %v1626_v50, %s2653_s30 }
0x1685   : > { %v1629_v55 = vpop.permute.xlu2 %1628 }
0x1686   : > { %v1631_v57 = vadd.f32 %v1629_v55, %v1621_v54 }
0x1688   : > { %2380 = vtanh.f32 %v1631_v57  ;;  %v1646_v58 = vrot.slane %v1631_v57, 4 }
0x168a   : > { %1647 = vrot.lane.b32.xlu2 %v1646_v58, %s2655_s8 }
0x168e   : > { %v2381_v60 = vpop.eup %2380 }
0x168f   : > { %1634 = vrot.lane.b32.xlu0 %v2381_v60, %s2652_s5 }
0x1697   : > { %1650 = vrot.lane.b32.xlu0 %v1568_v51, %s2655_s8 }
0x16e4   : > { %v1648_v53 = vpop.permute.xlu2 %1647 }
0x1701   : > { %v1635_v61 = vpop.permute.xlu0 %1634 }
0x1702   : > { %v1637_v62 = vmul.f32 %v1635_v61, %v1615_v42 }
0x1704   : > { %v1639_v3 = vrot.slane %v1637_v62, 4 }
0x1706   : > { %1640 = vrot.lane.b32.xlu1 %v1639_v3, %s2653_s30  ;;  %v1183_v3 = vsel %vm1178_vm2, %v3187_v59, %v3184_v38 }
0x1709   : > { %v1651_v6 = vpop.permute.xlu0 %1650 }
0x170a   : > { %v1653_v9 = vsel %vm919_vm12, %v1648_v53, %v1651_v6  ;;  %v1237_v6 = vrot.slane %v1183_v3, 4 }
0x170b   : > { %1699 = vrot.lane.b32.xlu2 %v1653_v9, %s2653_s30 }
0x1765   : > { %v3263_v31 = vpop.permute.xlu2 %1699 }
0x1778   : > { %v1641_v7 = vpop.permute.xlu1 %1640 }
0x1779   : > { %v1644_v8 = vsel %vm919_vm12, %v1641_v7, %v1571_v2 }
0x177a   : > { %2197 = vmatmul.msk.f32.vlgmr.msra.gmra.mxu2 %vm564_vm0, %v1644_v8  ;;  %1719 = vrot.lane.b32.xlu2 %v1644_v8, %s2655_s8 }
0x17d4   : > { %v1720_v11 = vpop.permute.xlu2 %1719 }
0x17fd   : > { %v1674_v15 = vpop.f32.mrf.mxu2 }
0x17fe   : > { %v1677_v17 = vadd.f32 %v1674_v15, %v3258_v14 }
0x1800   : > { %2382 = vtanh.f32 %v1677_v17  ;;  %v2198_v12 = vmul.f32 -1.442695, %v1677_v17 }
0x1802   : > { %2384 = vpow2.f32 %v2198_v12 }
0x1806   : > { %v2383_v18 = vpop.eup %2382 }
0x1807   : > { %1704 = vrot.lane.b32.xlu1 %v2383_v18, %s2652_s5 }
0x1808   : > { %v2385_v20 = vpop.eup %2384 }
0x1809   : > { %v1681_v26 = vadd.f32 1.0, %v2385_v20 }
0x180b   : > { %2386 = vrcp.f32 %v1681_v26  ;;  %v1693_v28 = vand.u32 2147483648, %v1681_v26  ;;  %vm1687_vm12 = vweird.f32 %v1681_v26  ;;  %v1691_v63 = vand.u32 2147483647, %v1681_v26 }
0x180d   : > { %v1694_v29 = vor.u32 1.1754944e-38, %v1693_v28  ;;  %vm1692_vm6 = vcmp.eq.f32.partialorder %v1691_v63, 8.507059e+37 }
0x1811   : > { %v2387_v22 = vpop.eup %2386 }
0x1812   : > { %v1683_v23 = vmul.f32 %v2387_v22, %v1681_v26  ;;  %vm1688_vm4 = vweird.f32 %v2387_v22 }
0x1813   : > { %vm1689_vm10 = vmor %vm1687_vm12, %vm1688_vm4 }
0x1814   : > { %v1684_v24 = vsub.f32 1.0, %v1683_v23 }
0x1816   : > { %v1685_v25 = vmul.f32 %v2387_v22, %v1684_v24 }
0x1818   : > { %v1686_v27 = vadd.f32 %v2387_v22, %v1685_v25 }
0x181a   : > { %v1690_v0 = vsel %vm1689_vm10, %v2387_v22, %v1686_v27 }
0x181b   : > { %v1695_v30 = vsel %vm1692_vm6, %v1694_v29, %v1690_v0  ;;  %v2420_v0 = vld [vmem:[%s3369_s0] sm:$0xf] }
0x181c   : > { %v1702_v32 = vmul.f32 %v3263_v31, %v1695_v30  ;;  %vm1256_vm12 = vcmp.gt.s32.totalorder %v2420_v0, 7 }
0x1879   : > { %v1705_v1 = vpop.permute.xlu1 %1704 }
0x187a   : > { %v1707_v2 = vmul.f32 %v1705_v1, %v1695_v30  ;;  %v1257_v1 = vsel %vm1256_vm12, 1, %v2654_v33 }
0x187c   : > { %1709 = vrot.lane.b32.xlu0 %v1707_v2, %s2653_s30 }
0x18ee   : > { %v1710_v16 = vpop.permute.xlu0 %1709 }
0x18ef   : > { %v3266_v34 = vadd.f32 %v1710_v16, %v1702_v32 }
0x18f1   : > { %2388 = vtanh.f32 %v3266_v34  ;;  %v1723_v32 = vsel %vm1007_vm5, %v3266_v34, %v3263_v31 }
0x18f2   : > { %2390 = vtanh.f32 %v1215_v36  ;;  %v1774_v16 = vrot.slane %v1723_v32, 4 }
0x18f3   : > { %2392 = vpow2.f32 %v2185_v40 }
0x18f7   : > { %v2389_v37 = vpop.eup %2388 }
0x18f8   : > { %1715 = vrot.lane.b32.xlu1 %v2389_v37, %s2652_s5  ;;  %v2391_v39 = vpop.eup %2390 }
0x18f9   : > { %v2393_v41 = vpop.eup %2392 }
0x18fa   : > { %v1219_v43 = vadd.f32 1.0, %v2393_v41 }
0x18fc   : > { %2394 = vrcp.f32 %v1219_v43  ;;  %v1231_v42 = vand.u32 2147483648, %v1219_v43  ;;  %vm1225_vm11 = vweird.f32 %v1219_v43  ;;  %v1229_v51 = vand.u32 2147483647, %v1219_v43 }
0x18fe   : > { %v1232_v54 = vor.u32 1.1754944e-38, %v1231_v42  ;;  %vm1230_vm1 = vcmp.eq.f32.partialorder %v1229_v51, 8.507059e+37 }
0x1900   : > { %1241 = vrot.lane.b32.xlu1 %v2391_v39, %s2652_s5 }
0x1902   : > { %v2395_v44 = vpop.eup %2394 }
0x1903   : > { %v1221_v45 = vmul.f32 %v2395_v44, %v1219_v43  ;;  %vm1226_vm13 = vweird.f32 %v2395_v44 }
0x1904   : > { %vm1227_vm14 = vmor %vm1225_vm11, %vm1226_vm13 }
0x1905   : > { %v1222_v46 = vsub.f32 1.0, %v1221_v45 }
0x1907   : > { %v1223_v21 = vmul.f32 %v2395_v44, %v1222_v46 }
0x1909   : > { %v1224_v49 = vadd.f32 %v2395_v44, %v1223_v21 }
0x190b   : > { %v1228_v52 = vsel %vm1227_vm14, %v2395_v44, %v1224_v49 }
0x190c   : > { %v1233_v55 = vsel %vm1230_vm1, %v1232_v54, %v1228_v52 }
0x190d   : > { %v1239_v7 = vmul.f32 %v1237_v6, %v1233_v55 }
0x196a   : > { %v1716_v47 = vpop.permute.xlu1 %1715 }
0x196b   : > { %v1718_v48 = vmul.f32 %v1716_v47, %v1695_v30 }
0x196d   : > { %v1722_v50 = vsel %vm1007_vm5, %v1718_v48, %v1720_v11 }
0x196e   : > { %1725 = vrot.lane.b32.xlu0 %v1722_v50, %s2653_s30 }
0x1972   : > { %v1242_v57 = vpop.permute.xlu1 %1241 }
0x1973   : > { %v1244_v58 = vmul.f32 %v1242_v57, %v1233_v55 }
0x1976   : > { %1246 = vrot.lane.b32.xlu0 %v1244_v58, %s2653_s30 }
0x19e0   : > { %v3277_v60 = vpop.permute.xlu0 %1725 }
0x19e1   : > { %2199 = vmatmul.msk.f32.vlgmr.msra.gmra.mxu0 %vm564_vm0, %v3277_v60 }
0x19e8   : > { %v1247_v9 = vpop.permute.xlu0 %1246 }
0x19e9   : > { %v1249_v8 = vadd.f32 %v1247_v9, %v1239_v7 }
0x1a5e   : > { %v1746_v61 = vpop.f32.mrf.mxu0 }
0x1a5f   : > { %v1750_v62 = vrot.slane %v1746_v61, 4 }
0x1a61   : > { %v1752_v53 = vadd.f32 %v1750_v62, %v3258_v14 }
0x1a63   : > { %2396 = vtanh.f32 %v1752_v53  ;;  %v2200_v17 = vmul.f32 -1.442695, %v1752_v53 }
0x1a64   : > { %2398 = vtanh.f32 %v1249_v8 }
0x1a65   : > { %2400 = vpow2.f32 %v2200_v17 }
0x1a69   : > { %v2397_v13 = vpop.eup %2396 }
0x1a6a   : > { %1778 = vrot.lane.b32.xlu2 %v2397_v13, %s2652_s5  ;;  %v2399_v15 = vpop.eup %2398 }
0x1a6b   : > { %v2401_v18 = vpop.eup %2400 }
0x1a6c   : > { %v1756_v12 = vadd.f32 1.0, %v2401_v18 }
0x1a6e   : > { %2402 = vrcp.f32 %v1756_v12  ;;  %v1768_v22 = vand.u32 2147483648, %v1756_v12  ;;  %vm1762_vm8 = vweird.f32 %v1756_v12  ;;  %v1766_v23 = vand.u32 2147483647, %v1756_v12 }
0x1a70   : > { %v1769_v25 = vor.u32 1.1754944e-38, %v1768_v22  ;;  %vm1767_vm4 = vcmp.eq.f32.partialorder %v1766_v23, 8.507059e+37 }
0x1a72   : > { %1252 = vrot.lane.b32.xlu2 %v2399_v15, %s2652_s5 }
0x1a74   : > { %v2403_v38 = vpop.eup %2402 }
0x1a75   : > { %v1758_v59 = vmul.f32 %v2403_v38, %v1756_v12  ;;  %vm1763_vm3 = vweird.f32 %v2403_v38 }
0x1a76   : > { %vm1764_vm9 = vmor %vm1762_vm8, %vm1763_vm3 }
0x1a77   : > { %v1759_v14 = vsub.f32 1.0, %v1758_v59 }
0x1a79   : > { %v1760_v20 = vmul.f32 %v2403_v38, %v1759_v14 }
0x1a7b   : > { %v1761_v26 = vadd.f32 %v2403_v38, %v1760_v20 }
0x1a7d   : > { %v1765_v24 = vsel %vm1764_vm9, %v2403_v38, %v1761_v26 }
0x1a7e   : > { %v1770_v28 = vsel %vm1767_vm4, %v1769_v25, %v1765_v24 }
0x1a7f   : > { %v1776_v35 = vmul.f32 %v1774_v16, %v1770_v28 }
0x1ac4   : > { %v1779_v27 = vpop.permute.xlu2 %1778 }
0x1ac5   : > { %v1781_v63 = vmul.f32 %v1779_v27, %v1770_v28 }
0x1ac7   : > { %1783 = vrot.lane.b32.xlu1 %v1781_v63, %s2653_s30 }
0x1acc   : > { %v1253_v29 = vpop.permute.xlu2 %1252 }
0x1acd   : > { %v1255_v30 = vmul.f32 %v1253_v29, %v1233_v55 }
0x1acf   : > { %v1263_v2 = vrot.slane %v1255_v30, 4  ;;  %1259 = vperm.xlu1 %2289, %v1257_v1  }
0x1ad1   : > { %1264 = vrot.lane.b32.xlu2 %v1263_v2, %s2653_s30 }
0x1ad9   : > { %1805 = vrot.lane.b32.xlu2 %v1723_v32, %s2655_s8 }
0x1b2b   : > { %v1265_v41 = vpop.permute.xlu2 %1264 }
0x1b33   : > { %v1806_v43 = vpop.permute.xlu2 %1805 }
0x1b39   : > { %v1784_v36 = vpop.permute.xlu1 %1783 }
0x1b3a   : > { %v1786_v37 = vadd.f32 %v1784_v36, %v1776_v35 }
0x1b3c   : > { %2404 = vtanh.f32 %v1786_v37  ;;  %v1801_v39 = vrot.slane %v1786_v37, 4 }
0x1b3e   : > { %1802 = vrot.lane.b32.xlu1 %v1801_v39, %s2655_s8 }
0x1b41   : > { %v3300_v33 = vpop.permute.xlu1 %1259 }
0x1b42   : > { %v2405_v40 = vpop.eup %2404  ;;  %vm1261_vm10 = vcmp.eq.s32.totalorder %v3300_v33, 1 }
0x1b43   : > { %v1267_v5 = vsel %vm1261_vm10, %v1265_v41, %v3201_v19  ;;  %1789 = vrot.lane.b32.xlu0 %v2405_v40, %s2652_s5 }
0x1b44   : > { %1269 = vst.msk [vmem:[#allocation2 + $0x1c] sm:$0xf] %vm675_vm7, %v1267_v5 }
0x1b4b   : > { %v1277_v31 = vld [vmem:[#allocation2 + $0x1c] sm:$0xf] }
0x1b4c   : > { %1312 = vst [vmem:[#allocation1 + $0x31] ss:$2 sm:$0xff] %v1277_v31 }
0x1b53   : > { %v1316_v34 = vld.sshfl [vmem:[#allocation1 + $0x30] sm:$0xff pattern:$0x75316420] }
0x1b54   : > { %2189 = vmatmul.msk.f32.gmra.mxu3 %vm564_vm0, %v1316_v34 }
0x1bb0   : > { %v1803_v44 = vpop.permute.xlu1 %1802 }
0x1bb1   : > { %v1808_v45 = vsel %vm1090_vm15, %v1803_v44, %v1806_v43 }
0x1bb2   : > { %1854 = vrot.lane.b32.xlu1 %v1808_v45, %s2653_s30 }
0x1bb5   : > { %v1790_v46 = vpop.permute.xlu0 %1789 }
0x1bb6   : > { %v1792_v21 = vmul.f32 %v1790_v46, %v1770_v28 }
0x1bb8   : > { %v1794_v47 = vrot.slane %v1792_v21, 4 }
0x1bba   : > { %1795 = vrot.lane.b32.xlu0 %v1794_v47, %s2653_s30 }
0x1bd7   : > { %v1351_v49 = vpop.f32.mrf.mxu3 }
0x1bd8   : > { %v1352_v11 = vadd.f32 %v3170_v10, %v1351_v49 }
0x1c24   : > { %v1855_v8 = vpop.permute.xlu1 %1854 }
0x1c2c   : > { %v1796_v19 = vpop.permute.xlu0 %1795 }
0x1c2d   : > { %v1799_v48 = vsel %vm1090_vm15, %v1796_v19, %v3277_v60 }
0x1c2e   : > { %2201 = vmatmul.msk.f32.vlgmr.msrb.gmra.mxu1 %vm564_vm0, %v1799_v48  ;;  %1874 = vrot.lane.b32.xlu1 %v1799_v48, %s2655_s8 }
0x1ca0   : > { %v1875_v59 = vpop.permute.xlu1 %1874 }
0x1cab   : > { %v1829_v42 = vpop.f32.mrf.mxu1 }
0x1cac   : > { %v1832_v50 = vadd.f32 %v1829_v42, %v1352_v11 }
0x1cae   : > { %2406 = vtanh.f32 %v1832_v50  ;;  %v2202_v52 = vmul.f32 -1.442695, %v1832_v50 }
0x1cb0   : > { %2408 = vpow2.f32 %v2202_v52 }
0x1cb4   : > { %v2407_v51 = vpop.eup %2406 }
0x1cb5   : > { %1859 = vrot.lane.b32.xlu0 %v2407_v51, %s2652_s5 }
0x1cb6   : > { %v2409_v54 = vpop.eup %2408 }
0x1cb7   : > { %v1836_v55 = vadd.f32 1.0, %v2409_v54 }
0x1cb9   : > { %2410 = vrcp.f32 %v1836_v55  ;;  %v1848_v62 = vand.u32 2147483648, %v1836_v55  ;;  %vm1842_vm15 = vweird.f32 %v1836_v55  ;;  %v1846_v10 = vand.u32 2147483647, %v1836_v55 }
0x1cbb   : > { %v1849_v53 = vor.u32 1.1754944e-38, %v1848_v62  ;;  %vm1847_vm13 = vcmp.eq.f32.partialorder %v1846_v10, 8.507059e+37 }
0x1cbf   : > { %v2411_v56 = vpop.eup %2410 }
0x1cc0   : > { %v1838_v57 = vmul.f32 %v2411_v56, %v1836_v55  ;;  %vm1843_vm5 = vweird.f32 %v2411_v56 }
0x1cc1   : > { %vm1844_vm6 = vmor %vm1842_vm15, %vm1843_vm5 }
0x1cc2   : > { %v1839_v58 = vsub.f32 1.0, %v1838_v57 }
0x1cc4   : > { %v1840_v60 = vmul.f32 %v2411_v56, %v1839_v58 }
0x1cc6   : > { %v1841_v61 = vadd.f32 %v2411_v56, %v1840_v60 }
0x1cc8   : > { %v1845_v3 = vsel %vm1844_vm6, %v2411_v56, %v1841_v61 }
0x1cc9   : > { %v1850_v9 = vsel %vm1847_vm13, %v1849_v53, %v1845_v3 }
0x1cca   : > { %v1857_v13 = vmul.f32 %v1855_v8, %v1850_v9 }
0x1d27   : > { %v1860_v6 = vpop.permute.xlu0 %1859 }
0x1d28   : > { %v1862_v7 = vmul.f32 %v1860_v6, %v1850_v9 }
0x1d2a   : > { %1864 = vrot.lane.b32.xlu2 %v1862_v7, %s2653_s30 }
0x1d84   : > { %v1865_v15 = vpop.permute.xlu2 %1864 }
0x1d85   : > { %v1867_v17 = vadd.f32 %v1865_v15, %v1857_v13 }
0x1d87   : > { %2412 = vtanh.f32 %v1867_v17  ;;  %v1878_v25 = vsel %vm1178_vm2, %v1867_v17, %v1855_v8 }
0x1d88   : > { %v1929_v40 = vrot.slane %v1878_v25, 4 }
0x1d8d   : > { %v2413_v18 = vpop.eup %2412 }
0x1d8e   : > { %1870 = vrot.lane.b32.xlu0 %v2413_v18, %s2652_s5 }
0x1e00   : > { %v1871_v12 = vpop.permute.xlu0 %1870 }
0x1e01   : > { %v1873_v38 = vmul.f32 %v1871_v12, %v1850_v9 }
0x1e03   : > { %v1877_v14 = vsel %vm1178_vm2, %v1873_v38, %v1875_v59 }
0x1e04   : > { %1880 = vrot.lane.b32.xlu2 %v1877_v14, %s2653_s30 }
0x1e5e   : > { %v1881_v20 = vpop.permute.xlu2 %1880 }
0x1e5f   : > { %2203 = vmatmul.msk.f32.vlgmr.msrb.gmra.mxu2 %vm564_vm0, %v1881_v20 }
0x1ee2   : > { %v1901_v26 = vpop.f32.mrf.mxu2 }
0x1ee3   : > { %v1905_v22 = vrot.slane %v1901_v26, 4 }
0x1ee5   : > { %v1907_v23 = vadd.f32 %v1905_v22, %v1352_v11 }
0x1ee7   : > { %2414 = vtanh.f32 %v1907_v23  ;;  %v2204_v27 = vmul.f32 -1.442695, %v1907_v23 }
0x1ee9   : > { %2416 = vpow2.f32 %v2204_v27 }
0x1eed   : > { %v2415_v24 = vpop.eup %2414 }
0x1eee   : > { %1933 = vrot.lane.b32.xlu0 %v2415_v24, %s2652_s5  ;;  %s1967_s5 = sshll.u32 %s1963_s10, 4  ;;  %s1968_s5 = int_to_ptr.hbm [resolvable:$true] %s1967_s5 }
0x1eef   : > { %v2417_v28 = vpop.eup %2416  ;;  %s2585_s26 = sshra.s32 %s1968_s5, 4  ;;  %s2586_s26 = int_to_ptr.hbm [resolvable:$true] %s2585_s26 }
0x1ef0   : > { %v1911_v63 = vadd.f32 1.0, %v2417_v28  ;;  %s2587_s9 = scalar_lea.hbm %s2586_s26, 4  ;;  %p2592_p4 = scmp.lt.s32.totalorder %s2586_s26, %s3418_s15 }
0x1ef1   : > { %p2588_p6 = scmp.ne.s32.totalorder %s2586_s26, %s2587_s9  ;;  %p2593_p5 = scmp.lt.s32.totalorder %s2591_s13, %s2587_s9 }
0x1ef2   : > { %2418 = vrcp.f32 %v1911_v63  ;;  %v1923_v32 = vand.u32 2147483648, %v1911_v63  ;;  %vm1917_vm11 = vweird.f32 %v1911_v63  ;;  %v1921_v16 = vand.u32 2147483647, %v1911_v63 }
0x1ef3   : > { %p2589_p2 = pnand %p2588_p6, %p2747_p11  ;;  %p2594_p7 = por %p2593_p5, %p2592_p4 }
0x1ef4   : > { %v1924_v35 = vor.u32 1.1754944e-38, %v1923_v32  ;;  %vm1922_vm2 = vcmp.eq.f32.partialorder %v1921_v16, 8.507059e+37 }
0x1ef5   : > { %p2590_p3 = pneg %p2589_p2 }
0x1ef6   : > { %1947 = vrot.lane.b32.xlu0 %v1878_v25, %s2655_s8 }
0x1ef7   : > { %p2595_p0 = pnand %p2594_p7, %p2590_p3 }
0x1ef8   : > { %v2419_v0 = vpop.eup %2418 }
0x1ef9   : > { %v1913_v29 = vmul.f32 %v2419_v0, %v1911_v63  ;;  %vm1918_vm0 = vweird.f32 %v2419_v0 }
0x1efa   : > { %vm1919_vm14 = vmor %vm1917_vm11, %vm1918_vm0 }
0x1efb   : > { %v1914_v1 = vsub.f32 1.0, %v1913_v29 }
0x1efd   : > { %v1915_v30 = vmul.f32 %v2419_v0, %v1914_v1 }
0x1eff   : > { %v1916_v2 = vadd.f32 %v2419_v0, %v1915_v30 }
0x1f01   : > { %v1920_v4 = vsel %vm1919_vm14, %v2419_v0, %v1916_v2 }
0x1f02   : > { %v1925_v37 = vsel %vm1922_vm2, %v1924_v35, %v1920_v4 }
0x1f03   : > { %v1931_v41 = vmul.f32 %v1929_v40, %v1925_v37 }
0x1f60   : > { %v1934_v36 = vpop.permute.xlu0 %1933 }
0x1f61   : > { %v1936_v39 = vmul.f32 %v1934_v36, %v1925_v37 }
0x1f63   : > { %1938 = vrot.lane.b32.xlu1 %v1936_v39, %s2653_s30  ;;  %s1953_s30 = scalar_lea.sflag [#allocation5], %s2886_s11 }
0x1f68   : > { %v1948_v43 = vpop.permute.xlu0 %1947 }
0x1fd5   : > { %v1939_v5 = vpop.permute.xlu1 %1938 }
0x1fd6   : > { %v1941_v31 = vadd.f32 %v1939_v5, %v1931_v41 }
0x1fd8   : > { %v1943_v34 = vrot.slane %v1941_v31, 4 }
0x1fda   : > { %1944 = vrot.lane.b32.xlu2 %v1943_v34, %s2655_s8 }
0x2034   : > { %v1945_v44 = vpop.permute.xlu2 %1944 }
0x2035   : > { %v1950_v45 = vsel %vm1261_vm10, %v1945_v44, %v1948_v43 }
0x2036   : > { %1951 = vst.msk [vmem:[%s509_s18] sm:$0xf] %vm675_vm7, %v1950_v45 }
0x2037   : > { %2598 = shalt.err (!%p2595_p0)
}
0x2038   : > { %2224 = dma.vmem_to_hbm [thread:$0]  (%p2747_p11), %s1966_s7, 64, %s1968_s5, %s1953_s30  }
0x2039 PF: > { %s3420_s11 = sld [smem:[#allocation17_spill]]  ;;  %p2243_p8 = pnand %p2144_p9, %p2751_p12 }
0x203b   : > { %p2244_p10 = pneg %p2243_p8 }
0x203f   : > { %s1979_s16 = sand.u32 1, %s3420_s11  }
0x2040   : > { %s1980_s21 = scalar_lea.sflag [#allocation5], %s1979_s16 }
0x2041   : > { %2628 = dma.done.wait (%p2244_p10), %s1980_s21, 64  }
0x2042   : > { %2630 = vsyncadd (%p2244_p10), %s1980_s21, 4294967232  ;;  %s3423_s30 = sld [smem:[#allocation20_spill]]  ;;  %s3426_s27 = smov %s2637_s28 }
0x2043   : > { %s3424_s23 = sld [smem:[#allocation18_spill]] }
0x2044   : > { %s3425_s29 = sld [smem:[#allocation21_spill]] }
0x2048   : > { %p27_p1 = scmp.ge.s32.totalorder %s3423_s30, 4  }
0x2049   : > { %s3427_s28 = smov %s3424_s23 }
0x204a   :  { %29 = sbr.rel (!%p27_p1) target bundleno = 14 (0xe), region = 172 }
0x204f   :  { %1986 = vsyncpa [#allocation4], 1 }
0x2050   :  { %1988 = vsyncpa [#allocation4 + $0x1], 1 }
0x2051   :  { %1989 = vsyncpa [#allocation7], 1 }
0x2052   :  { %1991 = vsyncpa [#allocation7 + $0x1], 1 }
0x2053   :  { %1992 = vsyncpa [#allocation10], 1 }
0x2054   :  { %1994 = vsyncpa [#allocation10 + $0x1], 1 }
0x2055   :  { %1995 = vsyncpa [#allocation5], 1 }
0x2056   :  { %1997 = vsyncpa [#allocation5 + $0x1], 1 }

</bundles_post_ra>
